<compile_context>
chip_gen: v6e
topology: v6e:2x2x1
jax: 0.10.0
libtpu: 0.0.40
codegen_flags: <defaults>
</compile_context>

<pallas_src>
import functools

import jax
import jax.numpy as jnp
from jax import lax
from jax.experimental import pallas as pl
from jax.experimental.pallas import tpu as pltpu

THRESHOLD = 1.0
CURRENT_DECAY = 0.1
VOLTAGE_DECAY = 0.1

LAYER_SIZES = [(784, 128), (128, 64), (64, 1)]   # (Cin, Cout) per block
LANES = 128                                      # lane-dense padded channel width
SUBLANES = 8


def fused_cuba_snn_kernel(x_ref, w1_ref, w2_ref, w3_ref, out_ref,
                          s1_ref, s2_ref, *,
                          threshold, current_decay, voltage_decay,
                          n_steps, n_pad):
    """Fused 784->128->64->1 CUBA SNN.

    x_ref   : [T*Npad, 784]  bf16  input spikes (batch padded, time-major, flat)
    w*_ref  : [Cin(_pad), 128] bf16  pre-transposed, zero-padded weights
    out_ref : [T*Npad, 128]  f32   final-layer spikes (only lane 0 is real)
    s1_ref, s2_ref : VMEM f32 scratch holding a layer's synaptic input z and
                     then (overwritten in place) its output spikes.
    """

    def dense(x_bf16, w_ref):
        # [M, K] x [K, Cout] -> [M, Cout]; Cout lands on lanes, MXU, f32 acc.
        return lax.dot_general(
            x_bf16, w_ref[...],
            dimension_numbers=(((1,), (0,)), ((), ())),
            preferred_element_type=jnp.float32)

    def lif_inplace(z_ref):
        # z_ref holds z[t] stacked as [T*Npad, C]; overwritten with spikes[t].
        c = z_ref.shape[-1]
        zeros = jnp.zeros((n_pad, c), jnp.float32)

        def step(t, carry):
            cur, vol = carry
            row = pl.multiple_of(t * n_pad, n_pad)        # tile-aligned offset
            z_t = z_ref[pl.ds(row, n_pad), :]
            cur = cur * (1.0 - current_decay) + z_t
            vol = vol * (1.0 - voltage_decay) + cur
            spk = (vol >= threshold).astype(jnp.float32)
            z_ref[pl.ds(row, n_pad), :] = spk
            return cur, vol * (1.0 - spk)                 # hard reset

        # T is small & static: fully unroll, state stays in registers.
        lax.fori_loop(0, n_steps, step, (zeros, zeros), unroll=True)

    # Layer 1: 784 -> 128
    s1_ref[...] = dense(x_ref[...], w1_ref)
    lif_inplace(s1_ref)
    # Layer 2: 128 -> 64 (padded to 128 lanes; padded channels never spike)
    s2_ref[...] = dense(s1_ref[...].astype(jnp.bfloat16), w2_ref)
    lif_inplace(s2_ref)
    # Layer 3: 64 -> 1 (padded to 128 lanes so the HBM store is unmasked)
    out_ref[...] = dense(s2_ref[...].astype(jnp.bfloat16), w3_ref)
    lif_inplace(out_ref)


def _pad_weight(w, cin_pad, cout_pad):
    """[Cout, Cin] f32 (PyTorch layout) -> transposed [cin_pad, cout_pad] bf16."""
    cout, cin = w.shape
    wt = jnp.zeros((cin_pad, cout_pad), jnp.bfloat16)
    return wt.at[:cin, :cout].set(w.T.astype(jnp.bfloat16))


def slayer_dense_snn_forward(spikes_nct, weights):
    """Full network forward.  spikes_nct: [N, 784, T] -> [N, 1, T] float32 spikes."""
    n, cin, t = spikes_nct.shape
    n_pad = ((n + SUBLANES - 1) // SUBLANES) * SUBLANES

    # NCT -> time-major [T, N, C], pad batch to a full sublane tile, flatten.
    x = jnp.transpose(spikes_nct, (2, 0, 1)).astype(jnp.float32)
    x = jnp.pad(x, ((0, 0), (0, n_pad - n), (0, 0)))
    x_flat = x.reshape(t * n_pad, cin).astype(jnp.bfloat16)

    # Pre-transpose / zero-pad / cast weights once at trace time.
    w1 = _pad_weight(weights[0], cin, LANES)          # [784, 128]
    w2 = _pad_weight(weights[1], LANES, LANES)        # [128, 128] (64 real cols)
    w3 = _pad_weight(weights[2], LANES, LANES)        # [128, 128] (64x1 real)

    kernel = functools.partial(
        fused_cuba_snn_kernel,
        threshold=THRESHOLD,
        current_decay=CURRENT_DECAY,
        voltage_decay=VOLTAGE_DECAY,
        n_steps=t,
        n_pad=n_pad,
    )
    m = t * n_pad
    # TODO(synk): if N (or T) grows, add a "parallel" grid over batch blocks
    # (full T per block) sized for v7x's 64 MiB VMEM and its 2 TensorCores.
    out_flat = pl.pallas_call(
        kernel,
        out_shape=jax.ShapeDtypeStruct((m, LANES), jnp.float32),
        in_specs=[
            pl.BlockSpec((m, cin), lambda: (0, 0)),
            pl.BlockSpec((cin, LANES), lambda: (0, 0)),
            pl.BlockSpec((LANES, LANES), lambda: (0, 0)),
            pl.BlockSpec((LANES, LANES), lambda: (0, 0)),
        ],
        out_specs=pl.BlockSpec((m, LANES), lambda: (0, 0)),
        scratch_shapes=[
            pltpu.VMEM((m, LANES), jnp.float32),   # layer-1 z, then spikes
            pltpu.VMEM((m, LANES), jnp.float32),   # layer-2 z, then spikes
        ],
    )(x_flat, w1, w2, w3)

    # [T*Npad, 128] -> [T, N, 1] -> NCT [N, 1, T]
    out = out_flat.reshape(t, n_pad, LANES)[:, :n, :1]
    return jnp.transpose(out, (1, 2, 0))


def init_params(key):
    """Deterministic weights, PyTorch Linear layout [Cout, Cin], W ~ N(0, 1/fan_in)."""
    weights = []
    for cin, cout in LAYER_SIZES:
        key, sub = jax.random.split(key)
        weights.append(
            jax.random.normal(sub, (cout, cin), jnp.float32) / jnp.sqrt(cin))
    return weights


if __name__ == "__main__":
    key = jax.random.PRNGKey(0)
    k_in, k_w = jax.random.split(key)

    N, C_IN, T = 2, 784, 8
    # Binary input spikes in the PyTorch slayer layout [N, C, T].
    spikes = (jax.random.uniform(k_in, (N, C_IN, T)) < 0.3).astype(jnp.float32)
    weights = init_params(k_w)

    fwd = jax.jit(slayer_dense_snn_forward)
    out = jax.block_until_ready(fwd(spikes, weights))

    assert out.shape == (N, 1, T), out.shape
    assert out.dtype == jnp.float32
    print("KERNEL_OK")
</pallas_src>

<mosaic_0001>
module attributes {stable_mosaic.version = 11 : i64} {
  func.func @fused_cuba_snn_kernel(%arg0: memref<64x784xbf16, #tpu.memory_space<vmem>>, %arg1: memref<784x128xbf16, #tpu.memory_space<vmem>>, %arg2: memref<128x128xbf16, #tpu.memory_space<vmem>>, %arg3: memref<128x128xbf16, #tpu.memory_space<vmem>>, %arg4: memref<64x128xf32, #tpu.memory_space<vmem>>, %arg5: memref<64x128xf32, #tpu.memory_space<vmem>>, %arg6: memref<64x128xf32, #tpu.memory_space<vmem>>) attributes {dimension_semantics = [], scalar_prefetch = 0 : i64, scratch_operands = 2 : i64, tpu.core_type = #tpu.core_type<tc>} {
    %c0 = arith.constant 0 : index
    %c0_0 = arith.constant 0 : index
    %0 = vector.load %arg0[%c0, %c0_0] : memref<64x784xbf16, #tpu.memory_space<vmem>>, vector<64x784xbf16>
    %c0_1 = arith.constant 0 : index
    %c0_2 = arith.constant 0 : index
    %1 = vector.load %arg1[%c0_1, %c0_2] : memref<784x128xbf16, #tpu.memory_space<vmem>>, vector<784x128xbf16>
    %cst = arith.constant dense<0.000000e+00> : vector<64x128xf32>
    %2 = tpu.matmul %0, %1, %cst {dimension_numbers = #tpu.dot_dimension_numbers<[1], [0], [0], [1], [0, 0, 1, 1], [], []>} : vector<64x784xbf16>, vector<784x128xbf16>, vector<64x128xf32> -> vector<64x128xf32>
    %c0_3 = arith.constant 0 : index
    %c0_4 = arith.constant 0 : index
    %3 = vector.load %arg5[%c0_3, %c0_4] : memref<64x128xf32, #tpu.memory_space<vmem>>, vector<64x128xf32>
    tpu.vector_store %arg5[%c0_3, %c0_4], %2 {strides = array<i32>} : memref<64x128xf32, #tpu.memory_space<vmem>>, vector<64x128xf32>,
    %cst_5 = arith.constant 0.000000e+00 : f32
    %4 = vector.broadcast %cst_5 : f32 to vector<8x128xf32>
    %c0_i32 = arith.constant 0 : i32
    %c8_i32 = arith.constant 8 : i32
    %5 = arith.muli %c0_i32, %c8_i32 : i32
    %6 = tpu.assume_multiple %5, 8 : i32
    %7 = arith.index_cast %6 : i32 to index
    %c0_6 = arith.constant 0 : index
    %8 = vector.load %arg5[%7, %c0_6] : memref<64x128xf32, #tpu.memory_space<vmem>>, vector<8x128xf32>
    %cst_7 = arith.constant 0.899999976 : f32
    %9 = vector.broadcast %cst_7 : f32 to vector<8x128xf32>
    %10 = arith.mulf %4, %9 : vector<8x128xf32>
    %11 = arith.addf %10, %8 : vector<8x128xf32>
    %cst_8 = arith.constant 0.899999976 : f32
    %12 = vector.broadcast %cst_8 : f32 to vector<8x128xf32>
    %13 = arith.mulf %4, %12 : vector<8x128xf32>
    %14 = arith.addf %13, %11 : vector<8x128xf32>
    %cst_9 = arith.constant 1.000000e+00 : f32
    %15 = vector.broadcast %cst_9 : f32 to vector<8x128xf32>
    %16 = arith.cmpf oge, %14, %15 : vector<8x128xf32>
    %17 = arith.extui %16 : vector<8x128xi1> to vector<8x128xi32>
    %18 = arith.sitofp %17 : vector<8x128xi32> to vector<8x128xf32>
    %19 = arith.index_cast %6 : i32 to index
    %c0_10 = arith.constant 0 : index
    %20 = vector.load %arg5[%19, %c0_10] : memref<64x128xf32, #tpu.memory_space<vmem>>, vector<8x128xf32>
    tpu.vector_store %arg5[%19, %c0_10], %18 {strides = array<i32>} : memref<64x128xf32, #tpu.memory_space<vmem>>, vector<8x128xf32>,
    %cst_11 = arith.constant 1.000000e+00 : f32
    %21 = vector.broadcast %cst_11 : f32 to vector<8x128xf32>
    %22 = arith.subf %21, %18 : vector<8x128xf32>
    %23 = arith.mulf %14, %22 : vector<8x128xf32>
    %c1_i32 = arith.constant 1 : i32
    %c8_i32_12 = arith.constant 8 : i32
    %24 = arith.muli %c1_i32, %c8_i32_12 : i32
    %25 = tpu.assume_multiple %24, 8 : i32
    %26 = arith.index_cast %25 : i32 to index
    %c0_13 = arith.constant 0 : index
    %27 = vector.load %arg5[%26, %c0_13] : memref<64x128xf32, #tpu.memory_space<vmem>>, vector<8x128xf32>
    %cst_14 = arith.constant 0.899999976 : f32
    %28 = vector.broadcast %cst_14 : f32 to vector<8x128xf32>
    %29 = arith.mulf %11, %28 : vector<8x128xf32>
    %30 = arith.addf %29, %27 : vector<8x128xf32>
    %cst_15 = arith.constant 0.899999976 : f32
    %31 = vector.broadcast %cst_15 : f32 to vector<8x128xf32>
    %32 = arith.mulf %23, %31 : vector<8x128xf32>
    %33 = arith.addf %32, %30 : vector<8x128xf32>
    %cst_16 = arith.constant 1.000000e+00 : f32
    %34 = vector.broadcast %cst_16 : f32 to vector<8x128xf32>
    %35 = arith.cmpf oge, %33, %34 : vector<8x128xf32>
    %36 = arith.extui %35 : vector<8x128xi1> to vector<8x128xi32>
    %37 = arith.sitofp %36 : vector<8x128xi32> to vector<8x128xf32>
    %38 = arith.index_cast %25 : i32 to index
    %c0_17 = arith.constant 0 : index
    %39 = vector.load %arg5[%38, %c0_17] : memref<64x128xf32, #tpu.memory_space<vmem>>, vector<8x128xf32>
    tpu.vector_store %arg5[%38, %c0_17], %37 {strides = array<i32>} : memref<64x128xf32, #tpu.memory_space<vmem>>, vector<8x128xf32>,
    %cst_18 = arith.constant 1.000000e+00 : f32
    %40 = vector.broadcast %cst_18 : f32 to vector<8x128xf32>
    %41 = arith.subf %40, %37 : vector<8x128xf32>
    %42 = arith.mulf %33, %41 : vector<8x128xf32>
    %c2_i32 = arith.constant 2 : i32
    %c8_i32_19 = arith.constant 8 : i32
    %43 = arith.muli %c2_i32, %c8_i32_19 : i32
    %44 = tpu.assume_multiple %43, 8 : i32
    %45 = arith.index_cast %44 : i32 to index
    %c0_20 = arith.constant 0 : index
    %46 = vector.load %arg5[%45, %c0_20] : memref<64x128xf32, #tpu.memory_space<vmem>>, vector<8x128xf32>
    %cst_21 = arith.constant 0.899999976 : f32
    %47 = vector.broadcast %cst_21 : f32 to vector<8x128xf32>
    %48 = arith.mulf %30, %47 : vector<8x128xf32>
    %49 = arith.addf %48, %46 : vector<8x128xf32>
    %cst_22 = arith.constant 0.899999976 : f32
    %50 = vector.broadcast %cst_22 : f32 to vector<8x128xf32>
    %51 = arith.mulf %42, %50 : vector<8x128xf32>
    %52 = arith.addf %51, %49 : vector<8x128xf32>
    %cst_23 = arith.constant 1.000000e+00 : f32
    %53 = vector.broadcast %cst_23 : f32 to vector<8x128xf32>
    %54 = arith.cmpf oge, %52, %53 : vector<8x128xf32>
    %55 = arith.extui %54 : vector<8x128xi1> to vector<8x128xi32>
    %56 = arith.sitofp %55 : vector<8x128xi32> to vector<8x128xf32>
    %57 = arith.index_cast %44 : i32 to index
    %c0_24 = arith.constant 0 : index
    %58 = vector.load %arg5[%57, %c0_24] : memref<64x128xf32, #tpu.memory_space<vmem>>, vector<8x128xf32>
    tpu.vector_store %arg5[%57, %c0_24], %56 {strides = array<i32>} : memref<64x128xf32, #tpu.memory_space<vmem>>, vector<8x128xf32>,
    %cst_25 = arith.constant 1.000000e+00 : f32
    %59 = vector.broadcast %cst_25 : f32 to vector<8x128xf32>
    %60 = arith.subf %59, %56 : vector<8x128xf32>
    %61 = arith.mulf %52, %60 : vector<8x128xf32>
    %c3_i32 = arith.constant 3 : i32
    %c8_i32_26 = arith.constant 8 : i32
    %62 = arith.muli %c3_i32, %c8_i32_26 : i32
    %63 = tpu.assume_multiple %62, 8 : i32
    %64 = arith.index_cast %63 : i32 to index
    %c0_27 = arith.constant 0 : index
    %65 = vector.load %arg5[%64, %c0_27] : memref<64x128xf32, #tpu.memory_space<vmem>>, vector<8x128xf32>
    %cst_28 = arith.constant 0.899999976 : f32
    %66 = vector.broadcast %cst_28 : f32 to vector<8x128xf32>
    %67 = arith.mulf %49, %66 : vector<8x128xf32>
    %68 = arith.addf %67, %65 : vector<8x128xf32>
    %cst_29 = arith.constant 0.899999976 : f32
    %69 = vector.broadcast %cst_29 : f32 to vector<8x128xf32>
    %70 = arith.mulf %61, %69 : vector<8x128xf32>
    %71 = arith.addf %70, %68 : vector<8x128xf32>
    %cst_30 = arith.constant 1.000000e+00 : f32
    %72 = vector.broadcast %cst_30 : f32 to vector<8x128xf32>
    %73 = arith.cmpf oge, %71, %72 : vector<8x128xf32>
    %74 = arith.extui %73 : vector<8x128xi1> to vector<8x128xi32>
    %75 = arith.sitofp %74 : vector<8x128xi32> to vector<8x128xf32>
    %76 = arith.index_cast %63 : i32 to index
    %c0_31 = arith.constant 0 : index
    %77 = vector.load %arg5[%76, %c0_31] : memref<64x128xf32, #tpu.memory_space<vmem>>, vector<8x128xf32>
    tpu.vector_store %arg5[%76, %c0_31], %75 {strides = array<i32>} : memref<64x128xf32, #tpu.memory_space<vmem>>, vector<8x128xf32>,
    %cst_32 = arith.constant 1.000000e+00 : f32
    %78 = vector.broadcast %cst_32 : f32 to vector<8x128xf32>
    %79 = arith.subf %78, %75 : vector<8x128xf32>
    %80 = arith.mulf %71, %79 : vector<8x128xf32>
    %c4_i32 = arith.constant 4 : i32
    %c8_i32_33 = arith.constant 8 : i32
    %81 = arith.muli %c4_i32, %c8_i32_33 : i32
    %82 = tpu.assume_multiple %81, 8 : i32
    %83 = arith.index_cast %82 : i32 to index
    %c0_34 = arith.constant 0 : index
    %84 = vector.load %arg5[%83, %c0_34] : memref<64x128xf32, #tpu.memory_space<vmem>>, vector<8x128xf32>
    %cst_35 = arith.constant 0.899999976 : f32
    %85 = vector.broadcast %cst_35 : f32 to vector<8x128xf32>
    %86 = arith.mulf %68, %85 : vector<8x128xf32>
    %87 = arith.addf %86, %84 : vector<8x128xf32>
    %cst_36 = arith.constant 0.899999976 : f32
    %88 = vector.broadcast %cst_36 : f32 to vector<8x128xf32>
    %89 = arith.mulf %80, %88 : vector<8x128xf32>
    %90 = arith.addf %89, %87 : vector<8x128xf32>
    %cst_37 = arith.constant 1.000000e+00 : f32
    %91 = vector.broadcast %cst_37 : f32 to vector<8x128xf32>
    %92 = arith.cmpf oge, %90, %91 : vector<8x128xf32>
    %93 = arith.extui %92 : vector<8x128xi1> to vector<8x128xi32>
    %94 = arith.sitofp %93 : vector<8x128xi32> to vector<8x128xf32>
    %95 = arith.index_cast %82 : i32 to index
    %c0_38 = arith.constant 0 : index
    %96 = vector.load %arg5[%95, %c0_38] : memref<64x128xf32, #tpu.memory_space<vmem>>, vector<8x128xf32>
    tpu.vector_store %arg5[%95, %c0_38], %94 {strides = array<i32>} : memref<64x128xf32, #tpu.memory_space<vmem>>, vector<8x128xf32>,
    %cst_39 = arith.constant 1.000000e+00 : f32
    %97 = vector.broadcast %cst_39 : f32 to vector<8x128xf32>
    %98 = arith.subf %97, %94 : vector<8x128xf32>
    %99 = arith.mulf %90, %98 : vector<8x128xf32>
    %c5_i32 = arith.constant 5 : i32
    %c8_i32_40 = arith.constant 8 : i32
    %100 = arith.muli %c5_i32, %c8_i32_40 : i32
    %101 = tpu.assume_multiple %100, 8 : i32
    %102 = arith.index_cast %101 : i32 to index
    %c0_41 = arith.constant 0 : index
    %103 = vector.load %arg5[%102, %c0_41] : memref<64x128xf32, #tpu.memory_space<vmem>>, vector<8x128xf32>
    %cst_42 = arith.constant 0.899999976 : f32
    %104 = vector.broadcast %cst_42 : f32 to vector<8x128xf32>
    %105 = arith.mulf %87, %104 : vector<8x128xf32>
    %106 = arith.addf %105, %103 : vector<8x128xf32>
    %cst_43 = arith.constant 0.899999976 : f32
    %107 = vector.broadcast %cst_43 : f32 to vector<8x128xf32>
    %108 = arith.mulf %99, %107 : vector<8x128xf32>
    %109 = arith.addf %108, %106 : vector<8x128xf32>
    %cst_44 = arith.constant 1.000000e+00 : f32
    %110 = vector.broadcast %cst_44 : f32 to vector<8x128xf32>
    %111 = arith.cmpf oge, %109, %110 : vector<8x128xf32>
    %112 = arith.extui %111 : vector<8x128xi1> to vector<8x128xi32>
    %113 = arith.sitofp %112 : vector<8x128xi32> to vector<8x128xf32>
    %114 = arith.index_cast %101 : i32 to index
    %c0_45 = arith.constant 0 : index
    %115 = vector.load %arg5[%114, %c0_45] : memref<64x128xf32, #tpu.memory_space<vmem>>, vector<8x128xf32>
    tpu.vector_store %arg5[%114, %c0_45], %113 {strides = array<i32>} : memref<64x128xf32, #tpu.memory_space<vmem>>, vector<8x128xf32>,
    %cst_46 = arith.constant 1.000000e+00 : f32
    %116 = vector.broadcast %cst_46 : f32 to vector<8x128xf32>
    %117 = arith.subf %116, %113 : vector<8x128xf32>
    %118 = arith.mulf %109, %117 : vector<8x128xf32>
    %c6_i32 = arith.constant 6 : i32
    %c8_i32_47 = arith.constant 8 : i32
    %119 = arith.muli %c6_i32, %c8_i32_47 : i32
    %120 = tpu.assume_multiple %119, 8 : i32
    %121 = arith.index_cast %120 : i32 to index
    %c0_48 = arith.constant 0 : index
    %122 = vector.load %arg5[%121, %c0_48] : memref<64x128xf32, #tpu.memory_space<vmem>>, vector<8x128xf32>
    %cst_49 = arith.constant 0.899999976 : f32
    %123 = vector.broadcast %cst_49 : f32 to vector<8x128xf32>
    %124 = arith.mulf %106, %123 : vector<8x128xf32>
    %125 = arith.addf %124, %122 : vector<8x128xf32>
    %cst_50 = arith.constant 0.899999976 : f32
    %126 = vector.broadcast %cst_50 : f32 to vector<8x128xf32>
    %127 = arith.mulf %118, %126 : vector<8x128xf32>
    %128 = arith.addf %127, %125 : vector<8x128xf32>
    %cst_51 = arith.constant 1.000000e+00 : f32
    %129 = vector.broadcast %cst_51 : f32 to vector<8x128xf32>
    %130 = arith.cmpf oge, %128, %129 : vector<8x128xf32>
    %131 = arith.extui %130 : vector<8x128xi1> to vector<8x128xi32>
    %132 = arith.sitofp %131 : vector<8x128xi32> to vector<8x128xf32>
    %133 = arith.index_cast %120 : i32 to index
    %c0_52 = arith.constant 0 : index
    %134 = vector.load %arg5[%133, %c0_52] : memref<64x128xf32, #tpu.memory_space<vmem>>, vector<8x128xf32>
    tpu.vector_store %arg5[%133, %c0_52], %132 {strides = array<i32>} : memref<64x128xf32, #tpu.memory_space<vmem>>, vector<8x128xf32>,
    %cst_53 = arith.constant 1.000000e+00 : f32
    %135 = vector.broadcast %cst_53 : f32 to vector<8x128xf32>
    %136 = arith.subf %135, %132 : vector<8x128xf32>
    %137 = arith.mulf %128, %136 : vector<8x128xf32>
    %c7_i32 = arith.constant 7 : i32
    %c8_i32_54 = arith.constant 8 : i32
    %138 = arith.muli %c7_i32, %c8_i32_54 : i32
    %139 = tpu.assume_multiple %138, 8 : i32
    %140 = arith.index_cast %139 : i32 to index
    %c0_55 = arith.constant 0 : index
    %141 = vector.load %arg5[%140, %c0_55] : memref<64x128xf32, #tpu.memory_space<vmem>>, vector<8x128xf32>
    %cst_56 = arith.constant 0.899999976 : f32
    %142 = vector.broadcast %cst_56 : f32 to vector<8x128xf32>
    %143 = arith.mulf %125, %142 : vector<8x128xf32>
    %144 = arith.addf %143, %141 : vector<8x128xf32>
    %cst_57 = arith.constant 0.899999976 : f32
    %145 = vector.broadcast %cst_57 : f32 to vector<8x128xf32>
    %146 = arith.mulf %137, %145 : vector<8x128xf32>
    %147 = arith.addf %146, %144 : vector<8x128xf32>
    %cst_58 = arith.constant 1.000000e+00 : f32
    %148 = vector.broadcast %cst_58 : f32 to vector<8x128xf32>
    %149 = arith.cmpf oge, %147, %148 : vector<8x128xf32>
    %150 = arith.extui %149 : vector<8x128xi1> to vector<8x128xi32>
    %151 = arith.sitofp %150 : vector<8x128xi32> to vector<8x128xf32>
    %152 = arith.index_cast %139 : i32 to index
    %c0_59 = arith.constant 0 : index
    %153 = vector.load %arg5[%152, %c0_59] : memref<64x128xf32, #tpu.memory_space<vmem>>, vector<8x128xf32>
    tpu.vector_store %arg5[%152, %c0_59], %151 {strides = array<i32>} : memref<64x128xf32, #tpu.memory_space<vmem>>, vector<8x128xf32>,
    %cst_60 = arith.constant 1.000000e+00 : f32
    %154 = vector.broadcast %cst_60 : f32 to vector<8x128xf32>
    %155 = arith.subf %154, %151 : vector<8x128xf32>
    %156 = arith.mulf %147, %155 : vector<8x128xf32>
    %c8_i32_61 = arith.constant 8 : i32
    %c0_62 = arith.constant 0 : index
    %c0_63 = arith.constant 0 : index
    %157 = vector.load %arg5[%c0_62, %c0_63] : memref<64x128xf32, #tpu.memory_space<vmem>>, vector<64x128xf32>
    %158 = arith.truncf %157 : vector<64x128xf32> to vector<64x128xbf16>
    %c0_64 = arith.constant 0 : index
    %c0_65 = arith.constant 0 : index
    %159 = vector.load %arg2[%c0_64, %c0_65] : memref<128x128xbf16, #tpu.memory_space<vmem>>, vector<128x128xbf16>
    %cst_66 = arith.constant dense<0.000000e+00> : vector<64x128xf32>
    %160 = tpu.matmul %158, %159, %cst_66 {dimension_numbers = #tpu.dot_dimension_numbers<[1], [0], [0], [1], [0, 0, 1, 1], [], []>} : vector<64x128xbf16>, vector<128x128xbf16>, vector<64x128xf32> -> vector<64x128xf32>
    %c0_67 = arith.constant 0 : index
    %c0_68 = arith.constant 0 : index
    %161 = vector.load %arg6[%c0_67, %c0_68] : memref<64x128xf32, #tpu.memory_space<vmem>>, vector<64x128xf32>
    tpu.vector_store %arg6[%c0_67, %c0_68], %160 {strides = array<i32>} : memref<64x128xf32, #tpu.memory_space<vmem>>, vector<64x128xf32>,
    %cst_69 = arith.constant 0.000000e+00 : f32
    %162 = vector.broadcast %cst_69 : f32 to vector<8x128xf32>
    %c0_i32_70 = arith.constant 0 : i32
    %c8_i32_71 = arith.constant 8 : i32
    %163 = arith.muli %c0_i32_70, %c8_i32_71 : i32
    %164 = tpu.assume_multiple %163, 8 : i32
    %165 = arith.index_cast %164 : i32 to index
    %c0_72 = arith.constant 0 : index
    %166 = vector.load %arg6[%165, %c0_72] : memref<64x128xf32, #tpu.memory_space<vmem>>, vector<8x128xf32>
    %cst_73 = arith.constant 0.899999976 : f32
    %167 = vector.broadcast %cst_73 : f32 to vector<8x128xf32>
    %168 = arith.mulf %162, %167 : vector<8x128xf32>
    %169 = arith.addf %168, %166 : vector<8x128xf32>
    %cst_74 = arith.constant 0.899999976 : f32
    %170 = vector.broadcast %cst_74 : f32 to vector<8x128xf32>
    %171 = arith.mulf %162, %170 : vector<8x128xf32>
    %172 = arith.addf %171, %169 : vector<8x128xf32>
    %cst_75 = arith.constant 1.000000e+00 : f32
    %173 = vector.broadcast %cst_75 : f32 to vector<8x128xf32>
    %174 = arith.cmpf oge, %172, %173 : vector<8x128xf32>
    %175 = arith.extui %174 : vector<8x128xi1> to vector<8x128xi32>
    %176 = arith.sitofp %175 : vector<8x128xi32> to vector<8x128xf32>
    %177 = arith.index_cast %164 : i32 to index
    %c0_76 = arith.constant 0 : index
    %178 = vector.load %arg6[%177, %c0_76] : memref<64x128xf32, #tpu.memory_space<vmem>>, vector<8x128xf32>
    tpu.vector_store %arg6[%177, %c0_76], %176 {strides = array<i32>} : memref<64x128xf32, #tpu.memory_space<vmem>>, vector<8x128xf32>,
    %cst_77 = arith.constant 1.000000e+00 : f32
    %179 = vector.broadcast %cst_77 : f32 to vector<8x128xf32>
    %180 = arith.subf %179, %176 : vector<8x128xf32>
    %181 = arith.mulf %172, %180 : vector<8x128xf32>
    %c1_i32_78 = arith.constant 1 : i32
    %c8_i32_79 = arith.constant 8 : i32
    %182 = arith.muli %c1_i32_78, %c8_i32_79 : i32
    %183 = tpu.assume_multiple %182, 8 : i32
    %184 = arith.index_cast %183 : i32 to index
    %c0_80 = arith.constant 0 : index
    %185 = vector.load %arg6[%184, %c0_80] : memref<64x128xf32, #tpu.memory_space<vmem>>, vector<8x128xf32>
    %cst_81 = arith.constant 0.899999976 : f32
    %186 = vector.broadcast %cst_81 : f32 to vector<8x128xf32>
    %187 = arith.mulf %169, %186 : vector<8x128xf32>
    %188 = arith.addf %187, %185 : vector<8x128xf32>
    %cst_82 = arith.constant 0.899999976 : f32
    %189 = vector.broadcast %cst_82 : f32 to vector<8x128xf32>
    %190 = arith.mulf %181, %189 : vector<8x128xf32>
    %191 = arith.addf %190, %188 : vector<8x128xf32>
    %cst_83 = arith.constant 1.000000e+00 : f32
    %192 = vector.broadcast %cst_83 : f32 to vector<8x128xf32>
    %193 = arith.cmpf oge, %191, %192 : vector<8x128xf32>
    %194 = arith.extui %193 : vector<8x128xi1> to vector<8x128xi32>
    %195 = arith.sitofp %194 : vector<8x128xi32> to vector<8x128xf32>
    %196 = arith.index_cast %183 : i32 to index
    %c0_84 = arith.constant 0 : index
    %197 = vector.load %arg6[%196, %c0_84] : memref<64x128xf32, #tpu.memory_space<vmem>>, vector<8x128xf32>
    tpu.vector_store %arg6[%196, %c0_84], %195 {strides = array<i32>} : memref<64x128xf32, #tpu.memory_space<vmem>>, vector<8x128xf32>,
    %cst_85 = arith.constant 1.000000e+00 : f32
    %198 = vector.broadcast %cst_85 : f32 to vector<8x128xf32>
    %199 = arith.subf %198, %195 : vector<8x128xf32>
    %200 = arith.mulf %191, %199 : vector<8x128xf32>
    %c2_i32_86 = arith.constant 2 : i32
    %c8_i32_87 = arith.constant 8 : i32
    %201 = arith.muli %c2_i32_86, %c8_i32_87 : i32
    %202 = tpu.assume_multiple %201, 8 : i32
    %203 = arith.index_cast %202 : i32 to index
    %c0_88 = arith.constant 0 : index
    %204 = vector.load %arg6[%203, %c0_88] : memref<64x128xf32, #tpu.memory_space<vmem>>, vector<8x128xf32>
    %cst_89 = arith.constant 0.899999976 : f32
    %205 = vector.broadcast %cst_89 : f32 to vector<8x128xf32>
    %206 = arith.mulf %188, %205 : vector<8x128xf32>
    %207 = arith.addf %206, %204 : vector<8x128xf32>
    %cst_90 = arith.constant 0.899999976 : f32
    %208 = vector.broadcast %cst_90 : f32 to vector<8x128xf32>
    %209 = arith.mulf %200, %208 : vector<8x128xf32>
    %210 = arith.addf %209, %207 : vector<8x128xf32>
    %cst_91 = arith.constant 1.000000e+00 : f32
    %211 = vector.broadcast %cst_91 : f32 to vector<8x128xf32>
    %212 = arith.cmpf oge, %210, %211 : vector<8x128xf32>
    %213 = arith.extui %212 : vector<8x128xi1> to vector<8x128xi32>
    %214 = arith.sitofp %213 : vector<8x128xi32> to vector<8x128xf32>
    %215 = arith.index_cast %202 : i32 to index
    %c0_92 = arith.constant 0 : index
    %216 = vector.load %arg6[%215, %c0_92] : memref<64x128xf32, #tpu.memory_space<vmem>>, vector<8x128xf32>
    tpu.vector_store %arg6[%215, %c0_92], %214 {strides = array<i32>} : memref<64x128xf32, #tpu.memory_space<vmem>>, vector<8x128xf32>,
    %cst_93 = arith.constant 1.000000e+00 : f32
    %217 = vector.broadcast %cst_93 : f32 to vector<8x128xf32>
    %218 = arith.subf %217, %214 : vector<8x128xf32>
    %219 = arith.mulf %210, %218 : vector<8x128xf32>
    %c3_i32_94 = arith.constant 3 : i32
    %c8_i32_95 = arith.constant 8 : i32
    %220 = arith.muli %c3_i32_94, %c8_i32_95 : i32
    %221 = tpu.assume_multiple %220, 8 : i32
    %222 = arith.index_cast %221 : i32 to index
    %c0_96 = arith.constant 0 : index
    %223 = vector.load %arg6[%222, %c0_96] : memref<64x128xf32, #tpu.memory_space<vmem>>, vector<8x128xf32>
    %cst_97 = arith.constant 0.899999976 : f32
    %224 = vector.broadcast %cst_97 : f32 to vector<8x128xf32>
    %225 = arith.mulf %207, %224 : vector<8x128xf32>
    %226 = arith.addf %225, %223 : vector<8x128xf32>
    %cst_98 = arith.constant 0.899999976 : f32
    %227 = vector.broadcast %cst_98 : f32 to vector<8x128xf32>
    %228 = arith.mulf %219, %227 : vector<8x128xf32>
    %229 = arith.addf %228, %226 : vector<8x128xf32>
    %cst_99 = arith.constant 1.000000e+00 : f32
    %230 = vector.broadcast %cst_99 : f32 to vector<8x128xf32>
    %231 = arith.cmpf oge, %229, %230 : vector<8x128xf32>
    %232 = arith.extui %231 : vector<8x128xi1> to vector<8x128xi32>
    %233 = arith.sitofp %232 : vector<8x128xi32> to vector<8x128xf32>
    %234 = arith.index_cast %221 : i32 to index
    %c0_100 = arith.constant 0 : index
    %235 = vector.load %arg6[%234, %c0_100] : memref<64x128xf32, #tpu.memory_space<vmem>>, vector<8x128xf32>
    tpu.vector_store %arg6[%234, %c0_100], %233 {strides = array<i32>} : memref<64x128xf32, #tpu.memory_space<vmem>>, vector<8x128xf32>,
    %cst_101 = arith.constant 1.000000e+00 : f32
    %236 = vector.broadcast %cst_101 : f32 to vector<8x128xf32>
    %237 = arith.subf %236, %233 : vector<8x128xf32>
    %238 = arith.mulf %229, %237 : vector<8x128xf32>
    %c4_i32_102 = arith.constant 4 : i32
    %c8_i32_103 = arith.constant 8 : i32
    %239 = arith.muli %c4_i32_102, %c8_i32_103 : i32
    %240 = tpu.assume_multiple %239, 8 : i32
    %241 = arith.index_cast %240 : i32 to index
    %c0_104 = arith.constant 0 : index
    %242 = vector.load %arg6[%241, %c0_104] : memref<64x128xf32, #tpu.memory_space<vmem>>, vector<8x128xf32>
    %cst_105 = arith.constant 0.899999976 : f32
    %243 = vector.broadcast %cst_105 : f32 to vector<8x128xf32>
    %244 = arith.mulf %226, %243 : vector<8x128xf32>
    %245 = arith.addf %244, %242 : vector<8x128xf32>
    %cst_106 = arith.constant 0.899999976 : f32
    %246 = vector.broadcast %cst_106 : f32 to vector<8x128xf32>
    %247 = arith.mulf %238, %246 : vector<8x128xf32>
    %248 = arith.addf %247, %245 : vector<8x128xf32>
    %cst_107 = arith.constant 1.000000e+00 : f32
    %249 = vector.broadcast %cst_107 : f32 to vector<8x128xf32>
    %250 = arith.cmpf oge, %248, %249 : vector<8x128xf32>
    %251 = arith.extui %250 : vector<8x128xi1> to vector<8x128xi32>
    %252 = arith.sitofp %251 : vector<8x128xi32> to vector<8x128xf32>
    %253 = arith.index_cast %240 : i32 to index
    %c0_108 = arith.constant 0 : index
    %254 = vector.load %arg6[%253, %c0_108] : memref<64x128xf32, #tpu.memory_space<vmem>>, vector<8x128xf32>
    tpu.vector_store %arg6[%253, %c0_108], %252 {strides = array<i32>} : memref<64x128xf32, #tpu.memory_space<vmem>>, vector<8x128xf32>,
    %cst_109 = arith.constant 1.000000e+00 : f32
    %255 = vector.broadcast %cst_109 : f32 to vector<8x128xf32>
    %256 = arith.subf %255, %252 : vector<8x128xf32>
    %257 = arith.mulf %248, %256 : vector<8x128xf32>
    %c5_i32_110 = arith.constant 5 : i32
    %c8_i32_111 = arith.constant 8 : i32
    %258 = arith.muli %c5_i32_110, %c8_i32_111 : i32
    %259 = tpu.assume_multiple %258, 8 : i32
    %260 = arith.index_cast %259 : i32 to index
    %c0_112 = arith.constant 0 : index
    %261 = vector.load %arg6[%260, %c0_112] : memref<64x128xf32, #tpu.memory_space<vmem>>, vector<8x128xf32>
    %cst_113 = arith.constant 0.899999976 : f32
    %262 = vector.broadcast %cst_113 : f32 to vector<8x128xf32>
    %263 = arith.mulf %245, %262 : vector<8x128xf32>
    %264 = arith.addf %263, %261 : vector<8x128xf32>
    %cst_114 = arith.constant 0.899999976 : f32
    %265 = vector.broadcast %cst_114 : f32 to vector<8x128xf32>
    %266 = arith.mulf %257, %265 : vector<8x128xf32>
    %267 = arith.addf %266, %264 : vector<8x128xf32>
    %cst_115 = arith.constant 1.000000e+00 : f32
    %268 = vector.broadcast %cst_115 : f32 to vector<8x128xf32>
    %269 = arith.cmpf oge, %267, %268 : vector<8x128xf32>
    %270 = arith.extui %269 : vector<8x128xi1> to vector<8x128xi32>
    %271 = arith.sitofp %270 : vector<8x128xi32> to vector<8x128xf32>
    %272 = arith.index_cast %259 : i32 to index
    %c0_116 = arith.constant 0 : index
    %273 = vector.load %arg6[%272, %c0_116] : memref<64x128xf32, #tpu.memory_space<vmem>>, vector<8x128xf32>
    tpu.vector_store %arg6[%272, %c0_116], %271 {strides = array<i32>} : memref<64x128xf32, #tpu.memory_space<vmem>>, vector<8x128xf32>,
    %cst_117 = arith.constant 1.000000e+00 : f32
    %274 = vector.broadcast %cst_117 : f32 to vector<8x128xf32>
    %275 = arith.subf %274, %271 : vector<8x128xf32>
    %276 = arith.mulf %267, %275 : vector<8x128xf32>
    %c6_i32_118 = arith.constant 6 : i32
    %c8_i32_119 = arith.constant 8 : i32
    %277 = arith.muli %c6_i32_118, %c8_i32_119 : i32
    %278 = tpu.assume_multiple %277, 8 : i32
    %279 = arith.index_cast %278 : i32 to index
    %c0_120 = arith.constant 0 : index
    %280 = vector.load %arg6[%279, %c0_120] : memref<64x128xf32, #tpu.memory_space<vmem>>, vector<8x128xf32>
    %cst_121 = arith.constant 0.899999976 : f32
    %281 = vector.broadcast %cst_121 : f32 to vector<8x128xf32>
    %282 = arith.mulf %264, %281 : vector<8x128xf32>
    %283 = arith.addf %282, %280 : vector<8x128xf32>
    %cst_122 = arith.constant 0.899999976 : f32
    %284 = vector.broadcast %cst_122 : f32 to vector<8x128xf32>
    %285 = arith.mulf %276, %284 : vector<8x128xf32>
    %286 = arith.addf %285, %283 : vector<8x128xf32>
    %cst_123 = arith.constant 1.000000e+00 : f32
    %287 = vector.broadcast %cst_123 : f32 to vector<8x128xf32>
    %288 = arith.cmpf oge, %286, %287 : vector<8x128xf32>
    %289 = arith.extui %288 : vector<8x128xi1> to vector<8x128xi32>
    %290 = arith.sitofp %289 : vector<8x128xi32> to vector<8x128xf32>
    %291 = arith.index_cast %278 : i32 to index
    %c0_124 = arith.constant 0 : index
    %292 = vector.load %arg6[%291, %c0_124] : memref<64x128xf32, #tpu.memory_space<vmem>>, vector<8x128xf32>
    tpu.vector_store %arg6[%291, %c0_124], %290 {strides = array<i32>} : memref<64x128xf32, #tpu.memory_space<vmem>>, vector<8x128xf32>,
    %cst_125 = arith.constant 1.000000e+00 : f32
    %293 = vector.broadcast %cst_125 : f32 to vector<8x128xf32>
    %294 = arith.subf %293, %290 : vector<8x128xf32>
    %295 = arith.mulf %286, %294 : vector<8x128xf32>
    %c7_i32_126 = arith.constant 7 : i32
    %c8_i32_127 = arith.constant 8 : i32
    %296 = arith.muli %c7_i32_126, %c8_i32_127 : i32
    %297 = tpu.assume_multiple %296, 8 : i32
    %298 = arith.index_cast %297 : i32 to index
    %c0_128 = arith.constant 0 : index
    %299 = vector.load %arg6[%298, %c0_128] : memref<64x128xf32, #tpu.memory_space<vmem>>, vector<8x128xf32>
    %cst_129 = arith.constant 0.899999976 : f32
    %300 = vector.broadcast %cst_129 : f32 to vector<8x128xf32>
    %301 = arith.mulf %283, %300 : vector<8x128xf32>
    %302 = arith.addf %301, %299 : vector<8x128xf32>
    %cst_130 = arith.constant 0.899999976 : f32
    %303 = vector.broadcast %cst_130 : f32 to vector<8x128xf32>
    %304 = arith.mulf %295, %303 : vector<8x128xf32>
    %305 = arith.addf %304, %302 : vector<8x128xf32>
    %cst_131 = arith.constant 1.000000e+00 : f32
    %306 = vector.broadcast %cst_131 : f32 to vector<8x128xf32>
    %307 = arith.cmpf oge, %305, %306 : vector<8x128xf32>
    %308 = arith.extui %307 : vector<8x128xi1> to vector<8x128xi32>
    %309 = arith.sitofp %308 : vector<8x128xi32> to vector<8x128xf32>
    %310 = arith.index_cast %297 : i32 to index
    %c0_132 = arith.constant 0 : index
    %311 = vector.load %arg6[%310, %c0_132] : memref<64x128xf32, #tpu.memory_space<vmem>>, vector<8x128xf32>
    tpu.vector_store %arg6[%310, %c0_132], %309 {strides = array<i32>} : memref<64x128xf32, #tpu.memory_space<vmem>>, vector<8x128xf32>,
    %cst_133 = arith.constant 1.000000e+00 : f32
    %312 = vector.broadcast %cst_133 : f32 to vector<8x128xf32>
    %313 = arith.subf %312, %309 : vector<8x128xf32>
    %314 = arith.mulf %305, %313 : vector<8x128xf32>
    %c8_i32_134 = arith.constant 8 : i32
    %c0_135 = arith.constant 0 : index
    %c0_136 = arith.constant 0 : index
    %315 = vector.load %arg6[%c0_135, %c0_136] : memref<64x128xf32, #tpu.memory_space<vmem>>, vector<64x128xf32>
    %316 = arith.truncf %315 : vector<64x128xf32> to vector<64x128xbf16>
    %c0_137 = arith.constant 0 : index
    %c0_138 = arith.constant 0 : index
    %317 = vector.load %arg3[%c0_137, %c0_138] : memref<128x128xbf16, #tpu.memory_space<vmem>>, vector<128x128xbf16>
    %cst_139 = arith.constant dense<0.000000e+00> : vector<64x128xf32>
    %318 = tpu.matmul %316, %317, %cst_139 {dimension_numbers = #tpu.dot_dimension_numbers<[1], [0], [0], [1], [0, 0, 1, 1], [], []>} : vector<64x128xbf16>, vector<128x128xbf16>, vector<64x128xf32> -> vector<64x128xf32>
    %c0_140 = arith.constant 0 : index
    %c0_141 = arith.constant 0 : index
    %319 = vector.load %arg4[%c0_140, %c0_141] : memref<64x128xf32, #tpu.memory_space<vmem>>, vector<64x128xf32>
    tpu.vector_store %arg4[%c0_140, %c0_141], %318 {strides = array<i32>} : memref<64x128xf32, #tpu.memory_space<vmem>>, vector<64x128xf32>,
    %cst_142 = arith.constant 0.000000e+00 : f32
    %320 = vector.broadcast %cst_142 : f32 to vector<8x128xf32>
    %c0_i32_143 = arith.constant 0 : i32
    %c8_i32_144 = arith.constant 8 : i32
    %321 = arith.muli %c0_i32_143, %c8_i32_144 : i32
    %322 = tpu.assume_multiple %321, 8 : i32
    %323 = arith.index_cast %322 : i32 to index
    %c0_145 = arith.constant 0 : index
    %324 = vector.load %arg4[%323, %c0_145] : memref<64x128xf32, #tpu.memory_space<vmem>>, vector<8x128xf32>
    %cst_146 = arith.constant 0.899999976 : f32
    %325 = vector.broadcast %cst_146 : f32 to vector<8x128xf32>
    %326 = arith.mulf %320, %325 : vector<8x128xf32>
    %327 = arith.addf %326, %324 : vector<8x128xf32>
    %cst_147 = arith.constant 0.899999976 : f32
    %328 = vector.broadcast %cst_147 : f32 to vector<8x128xf32>
    %329 = arith.mulf %320, %328 : vector<8x128xf32>
    %330 = arith.addf %329, %327 : vector<8x128xf32>
    %cst_148 = arith.constant 1.000000e+00 : f32
    %331 = vector.broadcast %cst_148 : f32 to vector<8x128xf32>
    %332 = arith.cmpf oge, %330, %331 : vector<8x128xf32>
    %333 = arith.extui %332 : vector<8x128xi1> to vector<8x128xi32>
    %334 = arith.sitofp %333 : vector<8x128xi32> to vector<8x128xf32>
    %335 = arith.index_cast %322 : i32 to index
    %c0_149 = arith.constant 0 : index
    %336 = vector.load %arg4[%335, %c0_149] : memref<64x128xf32, #tpu.memory_space<vmem>>, vector<8x128xf32>
    tpu.vector_store %arg4[%335, %c0_149], %334 {strides = array<i32>} : memref<64x128xf32, #tpu.memory_space<vmem>>, vector<8x128xf32>,
    %cst_150 = arith.constant 1.000000e+00 : f32
    %337 = vector.broadcast %cst_150 : f32 to vector<8x128xf32>
    %338 = arith.subf %337, %334 : vector<8x128xf32>
    %339 = arith.mulf %330, %338 : vector<8x128xf32>
    %c1_i32_151 = arith.constant 1 : i32
    %c8_i32_152 = arith.constant 8 : i32
    %340 = arith.muli %c1_i32_151, %c8_i32_152 : i32
    %341 = tpu.assume_multiple %340, 8 : i32
    %342 = arith.index_cast %341 : i32 to index
    %c0_153 = arith.constant 0 : index
    %343 = vector.load %arg4[%342, %c0_153] : memref<64x128xf32, #tpu.memory_space<vmem>>, vector<8x128xf32>
    %cst_154 = arith.constant 0.899999976 : f32
    %344 = vector.broadcast %cst_154 : f32 to vector<8x128xf32>
    %345 = arith.mulf %327, %344 : vector<8x128xf32>
    %346 = arith.addf %345, %343 : vector<8x128xf32>
    %cst_155 = arith.constant 0.899999976 : f32
    %347 = vector.broadcast %cst_155 : f32 to vector<8x128xf32>
    %348 = arith.mulf %339, %347 : vector<8x128xf32>
    %349 = arith.addf %348, %346 : vector<8x128xf32>
    %cst_156 = arith.constant 1.000000e+00 : f32
    %350 = vector.broadcast %cst_156 : f32 to vector<8x128xf32>
    %351 = arith.cmpf oge, %349, %350 : vector<8x128xf32>
    %352 = arith.extui %351 : vector<8x128xi1> to vector<8x128xi32>
    %353 = arith.sitofp %352 : vector<8x128xi32> to vector<8x128xf32>
    %354 = arith.index_cast %341 : i32 to index
    %c0_157 = arith.constant 0 : index
    %355 = vector.load %arg4[%354, %c0_157] : memref<64x128xf32, #tpu.memory_space<vmem>>, vector<8x128xf32>
    tpu.vector_store %arg4[%354, %c0_157], %353 {strides = array<i32>} : memref<64x128xf32, #tpu.memory_space<vmem>>, vector<8x128xf32>,
    %cst_158 = arith.constant 1.000000e+00 : f32
    %356 = vector.broadcast %cst_158 : f32 to vector<8x128xf32>
    %357 = arith.subf %356, %353 : vector<8x128xf32>
    %358 = arith.mulf %349, %357 : vector<8x128xf32>
    %c2_i32_159 = arith.constant 2 : i32
    %c8_i32_160 = arith.constant 8 : i32
    %359 = arith.muli %c2_i32_159, %c8_i32_160 : i32
    %360 = tpu.assume_multiple %359, 8 : i32
    %361 = arith.index_cast %360 : i32 to index
    %c0_161 = arith.constant 0 : index
    %362 = vector.load %arg4[%361, %c0_161] : memref<64x128xf32, #tpu.memory_space<vmem>>, vector<8x128xf32>
    %cst_162 = arith.constant 0.899999976 : f32
    %363 = vector.broadcast %cst_162 : f32 to vector<8x128xf32>
    %364 = arith.mulf %346, %363 : vector<8x128xf32>
    %365 = arith.addf %364, %362 : vector<8x128xf32>
    %cst_163 = arith.constant 0.899999976 : f32
    %366 = vector.broadcast %cst_163 : f32 to vector<8x128xf32>
    %367 = arith.mulf %358, %366 : vector<8x128xf32>
    %368 = arith.addf %367, %365 : vector<8x128xf32>
    %cst_164 = arith.constant 1.000000e+00 : f32
    %369 = vector.broadcast %cst_164 : f32 to vector<8x128xf32>
    %370 = arith.cmpf oge, %368, %369 : vector<8x128xf32>
    %371 = arith.extui %370 : vector<8x128xi1> to vector<8x128xi32>
    %372 = arith.sitofp %371 : vector<8x128xi32> to vector<8x128xf32>
    %373 = arith.index_cast %360 : i32 to index
    %c0_165 = arith.constant 0 : index
    %374 = vector.load %arg4[%373, %c0_165] : memref<64x128xf32, #tpu.memory_space<vmem>>, vector<8x128xf32>
    tpu.vector_store %arg4[%373, %c0_165], %372 {strides = array<i32>} : memref<64x128xf32, #tpu.memory_space<vmem>>, vector<8x128xf32>,
    %cst_166 = arith.constant 1.000000e+00 : f32
    %375 = vector.broadcast %cst_166 : f32 to vector<8x128xf32>
    %376 = arith.subf %375, %372 : vector<8x128xf32>
    %377 = arith.mulf %368, %376 : vector<8x128xf32>
    %c3_i32_167 = arith.constant 3 : i32
    %c8_i32_168 = arith.constant 8 : i32
    %378 = arith.muli %c3_i32_167, %c8_i32_168 : i32
    %379 = tpu.assume_multiple %378, 8 : i32
    %380 = arith.index_cast %379 : i32 to index
    %c0_169 = arith.constant 0 : index
    %381 = vector.load %arg4[%380, %c0_169] : memref<64x128xf32, #tpu.memory_space<vmem>>, vector<8x128xf32>
    %cst_170 = arith.constant 0.899999976 : f32
    %382 = vector.broadcast %cst_170 : f32 to vector<8x128xf32>
    %383 = arith.mulf %365, %382 : vector<8x128xf32>
    %384 = arith.addf %383, %381 : vector<8x128xf32>
    %cst_171 = arith.constant 0.899999976 : f32
    %385 = vector.broadcast %cst_171 : f32 to vector<8x128xf32>
    %386 = arith.mulf %377, %385 : vector<8x128xf32>
    %387 = arith.addf %386, %384 : vector<8x128xf32>
    %cst_172 = arith.constant 1.000000e+00 : f32
    %388 = vector.broadcast %cst_172 : f32 to vector<8x128xf32>
    %389 = arith.cmpf oge, %387, %388 : vector<8x128xf32>
    %390 = arith.extui %389 : vector<8x128xi1> to vector<8x128xi32>
    %391 = arith.sitofp %390 : vector<8x128xi32> to vector<8x128xf32>
    %392 = arith.index_cast %379 : i32 to index
    %c0_173 = arith.constant 0 : index
    %393 = vector.load %arg4[%392, %c0_173] : memref<64x128xf32, #tpu.memory_space<vmem>>, vector<8x128xf32>
    tpu.vector_store %arg4[%392, %c0_173], %391 {strides = array<i32>} : memref<64x128xf32, #tpu.memory_space<vmem>>, vector<8x128xf32>,
    %cst_174 = arith.constant 1.000000e+00 : f32
    %394 = vector.broadcast %cst_174 : f32 to vector<8x128xf32>
    %395 = arith.subf %394, %391 : vector<8x128xf32>
    %396 = arith.mulf %387, %395 : vector<8x128xf32>
    %c4_i32_175 = arith.constant 4 : i32
    %c8_i32_176 = arith.constant 8 : i32
    %397 = arith.muli %c4_i32_175, %c8_i32_176 : i32
    %398 = tpu.assume_multiple %397, 8 : i32
    %399 = arith.index_cast %398 : i32 to index
    %c0_177 = arith.constant 0 : index
    %400 = vector.load %arg4[%399, %c0_177] : memref<64x128xf32, #tpu.memory_space<vmem>>, vector<8x128xf32>
    %cst_178 = arith.constant 0.899999976 : f32
    %401 = vector.broadcast %cst_178 : f32 to vector<8x128xf32>
    %402 = arith.mulf %384, %401 : vector<8x128xf32>
    %403 = arith.addf %402, %400 : vector<8x128xf32>
    %cst_179 = arith.constant 0.899999976 : f32
    %404 = vector.broadcast %cst_179 : f32 to vector<8x128xf32>
    %405 = arith.mulf %396, %404 : vector<8x128xf32>
    %406 = arith.addf %405, %403 : vector<8x128xf32>
    %cst_180 = arith.constant 1.000000e+00 : f32
    %407 = vector.broadcast %cst_180 : f32 to vector<8x128xf32>
    %408 = arith.cmpf oge, %406, %407 : vector<8x128xf32>
    %409 = arith.extui %408 : vector<8x128xi1> to vector<8x128xi32>
    %410 = arith.sitofp %409 : vector<8x128xi32> to vector<8x128xf32>
    %411 = arith.index_cast %398 : i32 to index
    %c0_181 = arith.constant 0 : index
    %412 = vector.load %arg4[%411, %c0_181] : memref<64x128xf32, #tpu.memory_space<vmem>>, vector<8x128xf32>
    tpu.vector_store %arg4[%411, %c0_181], %410 {strides = array<i32>} : memref<64x128xf32, #tpu.memory_space<vmem>>, vector<8x128xf32>,
    %cst_182 = arith.constant 1.000000e+00 : f32
    %413 = vector.broadcast %cst_182 : f32 to vector<8x128xf32>
    %414 = arith.subf %413, %410 : vector<8x128xf32>
    %415 = arith.mulf %406, %414 : vector<8x128xf32>
    %c5_i32_183 = arith.constant 5 : i32
    %c8_i32_184 = arith.constant 8 : i32
    %416 = arith.muli %c5_i32_183, %c8_i32_184 : i32
    %417 = tpu.assume_multiple %416, 8 : i32
    %418 = arith.index_cast %417 : i32 to index
    %c0_185 = arith.constant 0 : index
    %419 = vector.load %arg4[%418, %c0_185] : memref<64x128xf32, #tpu.memory_space<vmem>>, vector<8x128xf32>
    %cst_186 = arith.constant 0.899999976 : f32
    %420 = vector.broadcast %cst_186 : f32 to vector<8x128xf32>
    %421 = arith.mulf %403, %420 : vector<8x128xf32>
    %422 = arith.addf %421, %419 : vector<8x128xf32>
    %cst_187 = arith.constant 0.899999976 : f32
    %423 = vector.broadcast %cst_187 : f32 to vector<8x128xf32>
    %424 = arith.mulf %415, %423 : vector<8x128xf32>
    %425 = arith.addf %424, %422 : vector<8x128xf32>
    %cst_188 = arith.constant 1.000000e+00 : f32
    %426 = vector.broadcast %cst_188 : f32 to vector<8x128xf32>
    %427 = arith.cmpf oge, %425, %426 : vector<8x128xf32>
    %428 = arith.extui %427 : vector<8x128xi1> to vector<8x128xi32>
    %429 = arith.sitofp %428 : vector<8x128xi32> to vector<8x128xf32>
    %430 = arith.index_cast %417 : i32 to index
    %c0_189 = arith.constant 0 : index
    %431 = vector.load %arg4[%430, %c0_189] : memref<64x128xf32, #tpu.memory_space<vmem>>, vector<8x128xf32>
    tpu.vector_store %arg4[%430, %c0_189], %429 {strides = array<i32>} : memref<64x128xf32, #tpu.memory_space<vmem>>, vector<8x128xf32>,
    %cst_190 = arith.constant 1.000000e+00 : f32
    %432 = vector.broadcast %cst_190 : f32 to vector<8x128xf32>
    %433 = arith.subf %432, %429 : vector<8x128xf32>
    %434 = arith.mulf %425, %433 : vector<8x128xf32>
    %c6_i32_191 = arith.constant 6 : i32
    %c8_i32_192 = arith.constant 8 : i32
    %435 = arith.muli %c6_i32_191, %c8_i32_192 : i32
    %436 = tpu.assume_multiple %435, 8 : i32
    %437 = arith.index_cast %436 : i32 to index
    %c0_193 = arith.constant 0 : index
    %438 = vector.load %arg4[%437, %c0_193] : memref<64x128xf32, #tpu.memory_space<vmem>>, vector<8x128xf32>
    %cst_194 = arith.constant 0.899999976 : f32
    %439 = vector.broadcast %cst_194 : f32 to vector<8x128xf32>
    %440 = arith.mulf %422, %439 : vector<8x128xf32>
    %441 = arith.addf %440, %438 : vector<8x128xf32>
    %cst_195 = arith.constant 0.899999976 : f32
    %442 = vector.broadcast %cst_195 : f32 to vector<8x128xf32>
    %443 = arith.mulf %434, %442 : vector<8x128xf32>
    %444 = arith.addf %443, %441 : vector<8x128xf32>
    %cst_196 = arith.constant 1.000000e+00 : f32
    %445 = vector.broadcast %cst_196 : f32 to vector<8x128xf32>
    %446 = arith.cmpf oge, %444, %445 : vector<8x128xf32>
    %447 = arith.extui %446 : vector<8x128xi1> to vector<8x128xi32>
    %448 = arith.sitofp %447 : vector<8x128xi32> to vector<8x128xf32>
    %449 = arith.index_cast %436 : i32 to index
    %c0_197 = arith.constant 0 : index
    %450 = vector.load %arg4[%449, %c0_197] : memref<64x128xf32, #tpu.memory_space<vmem>>, vector<8x128xf32>
    tpu.vector_store %arg4[%449, %c0_197], %448 {strides = array<i32>} : memref<64x128xf32, #tpu.memory_space<vmem>>, vector<8x128xf32>,
    %cst_198 = arith.constant 1.000000e+00 : f32
    %451 = vector.broadcast %cst_198 : f32 to vector<8x128xf32>
    %452 = arith.subf %451, %448 : vector<8x128xf32>
    %453 = arith.mulf %444, %452 : vector<8x128xf32>
    %c7_i32_199 = arith.constant 7 : i32
    %c8_i32_200 = arith.constant 8 : i32
    %454 = arith.muli %c7_i32_199, %c8_i32_200 : i32
    %455 = tpu.assume_multiple %454, 8 : i32
    %456 = arith.index_cast %455 : i32 to index
    %c0_201 = arith.constant 0 : index
    %457 = vector.load %arg4[%456, %c0_201] : memref<64x128xf32, #tpu.memory_space<vmem>>, vector<8x128xf32>
    %cst_202 = arith.constant 0.899999976 : f32
    %458 = vector.broadcast %cst_202 : f32 to vector<8x128xf32>
    %459 = arith.mulf %441, %458 : vector<8x128xf32>
    %460 = arith.addf %459, %457 : vector<8x128xf32>
    %cst_203 = arith.constant 0.899999976 : f32
    %461 = vector.broadcast %cst_203 : f32 to vector<8x128xf32>
    %462 = arith.mulf %453, %461 : vector<8x128xf32>
    %463 = arith.addf %462, %460 : vector<8x128xf32>
    %cst_204 = arith.constant 1.000000e+00 : f32
    %464 = vector.broadcast %cst_204 : f32 to vector<8x128xf32>
    %465 = arith.cmpf oge, %463, %464 : vector<8x128xf32>
    %466 = arith.extui %465 : vector<8x128xi1> to vector<8x128xi32>
    %467 = arith.sitofp %466 : vector<8x128xi32> to vector<8x128xf32>
    %468 = arith.index_cast %455 : i32 to index
    %c0_205 = arith.constant 0 : index
    %469 = vector.load %arg4[%468, %c0_205] : memref<64x128xf32, #tpu.memory_space<vmem>>, vector<8x128xf32>
    tpu.vector_store %arg4[%468, %c0_205], %467 {strides = array<i32>} : memref<64x128xf32, #tpu.memory_space<vmem>>, vector<8x128xf32>,
    %cst_206 = arith.constant 1.000000e+00 : f32
    %470 = vector.broadcast %cst_206 : f32 to vector<8x128xf32>
    %471 = arith.subf %470, %467 : vector<8x128xf32>
    %472 = arith.mulf %463, %471 : vector<8x128xf32>
    %c8_i32_207 = arith.constant 8 : i32
    return
  }
}

</mosaic_0001>

<bundles_post_ra>
// kernel: slayer_dense_snn_forward.1
= control target key start
LH: loop header
LB: loop body
LE: loop exit
PB: predicated region body
PF: predicated region fallthrough
CT: control target
= control target key end

     0   :  { %vm582_vm0 = vcmask 130048   ;;  %s2298_s1 = inlined_call_operand.vmem [shape: bf16[784,128], index: 1, kind: input, shape index: {}]   ;;  %s2299_s0 = inlined_call_operand.vmem [shape: bf16[64,784], index: 0, kind: input, shape index: {}]   ;;  %s2300_s2 = inlined_call_operand.vmem [shape: bf16[128,128], index: 2, kind: input, shape index: {}]   ;;  %s2301_s3 = inlined_call_operand.vmem [shape: bf16[128,128], index: 3, kind: input, shape index: {}]   ;;  %s2302_s4 = inlined_call_operand.vmem [shape: f32[64,128], index: 4, kind: output, shape index: {}]  }
   0x1   :  { %v1798_v0 = vld [vmem:[%s2298_s1 + $0x78] sm:$0xff]   ;;  %v1802_v4 = vld [vmem:[%s2298_s1 + $0x70] sm:$0xff]   ;;  %v1806_v8 = vld [vmem:[%s2298_s1 + $0x68] sm:$0xff]  }
   0x2   :  { %v1799_v1 = vld [vmem:[%s2298_s1 + $0xf8] sm:$0xff]   ;;  %1589 = vmatprep.subr.bf16.mxu0 %v1798_v0  ;;  %v1803_v5 = vld [vmem:[%s2298_s1 + $0xf0] sm:$0xff]   ;;  %v1807_v9 = vld [vmem:[%s2298_s1 + $0xe8] sm:$0xff]  }
   0x3   :  { %v1800_v2 = vld [vmem:[%s2298_s1 + $0x38] sm:$0xff]   ;;  %1629 = vmatprep.subr.bf16.mxu1 %v1799_v1  ;;  %v1804_v6 = vld [vmem:[%s2298_s1 + $0x30] sm:$0xff]   ;;  %v1808_v10 = vld [vmem:[%s2298_s1 + $0x28] sm:$0xff]  }
   0x4   :  { %v1801_v3 = vld [vmem:[%s2298_s1 + $0xb8] sm:$0xff]   ;;  %1590 = vmatpush3.bf16.msra.mxu0 %v1800_v2  ;;  %v1805_v7 = vld [vmem:[%s2298_s1 + $0xb0] sm:$0xff]   ;;  %v1809_v11 = vld [vmem:[%s2298_s1 + $0xa8] sm:$0xff]  }
   0x5   :  { %1630 = vmatpush3.bf16.msra.mxu1 %v1801_v3  ;;  %1591 = vmatprep.subr.bf16.mxu0 %v1802_v4  ;;  %v1810_v12 = vld [vmem:[%s2298_s1 + $0x60] sm:$0xff]   ;;  %v1814_v16 = vld [vmem:[%s2298_s1 + $0x58] sm:$0xff]   ;;  %v1818_v20 = vld [vmem:[%s2298_s1 + $0x50] sm:$0xff]  }
   0x6   :  { %1631 = vmatprep.subr.bf16.mxu1 %v1803_v5  ;;  %v1811_v13 = vld [vmem:[%s2298_s1 + $0xe0] sm:$0xff]   ;;  %v1815_v17 = vld [vmem:[%s2298_s1 + $0xd8] sm:$0xff]   ;;  %v1819_v21 = vld [vmem:[%s2298_s1 + $0xd0] sm:$0xff]  }
   0x7   :  { %v1812_v14 = vld [vmem:[%s2298_s1 + $0x20] sm:$0xff]   ;;  %v1816_v18 = vld [vmem:[%s2298_s1 + $0x18] sm:$0xff]   ;;  %v1820_v22 = vld [vmem:[%s2298_s1 + $0x10] sm:$0xff]  }
   0x8   :  { %1592 = vmatpush3.bf16.msra.mxu0 %v1804_v6  ;;  %v1813_v15 = vld [vmem:[%s2298_s1 + $0xa0] sm:$0xff]   ;;  %v1817_v19 = vld [vmem:[%s2298_s1 + $0x98] sm:$0xff]   ;;  %v1821_v23 = vld [vmem:[%s2298_s1 + $0x90] sm:$0xff]  }
   0x9   :  { %1632 = vmatpush3.bf16.msra.mxu1 %v1805_v7  ;;  %1593 = vmatprep.subr.bf16.mxu0 %v1806_v8  ;;  %v1822_v24 = vld [vmem:[%s2298_s1 + $0x48] sm:$0xff]   ;;  %v1826_v28 = vld [vmem:[%s2298_s1 + $0x40] sm:$0xff]   ;;  %v1836_v36 = vld [vmem:[%s2298_s1 + $0x178] sm:$0xff]  }
   0xa   :  { %1633 = vmatprep.subr.bf16.mxu1 %v1807_v9  ;;  %v1823_v25 = vld [vmem:[%s2298_s1 + $0xc8] sm:$0xff]   ;;  %v1827_v29 = vld [vmem:[%s2298_s1 + $0xc0] sm:$0xff]   ;;  %v1837_v37 = vld [vmem:[%s2298_s1 + $0x138] sm:$0xff]  }
   0xb   :  { %v1824_v26 = vld [vmem:[%s2298_s1 + $0x8] sm:$0xff]   ;;  %v1828_v30 = vld [vmem:[%s2298_s1] sm:$0xff]   ;;  %v1838_v38 = vld [vmem:[%s2298_s1 + $0x170] sm:$0xff]  }
   0xc   :  { %1594 = vmatpush3.bf16.msra.mxu0 %v1808_v10  ;;  %v1825_v27 = vld [vmem:[%s2298_s1 + $0x88] sm:$0xff]   ;;  %v1829_v31 = vld [vmem:[%s2298_s1 + $0x80] sm:$0xff]   ;;  %v1840_v40 = vld [vmem:[%s2298_s1 + $0x130] sm:$0xff]  }
   0xd   :  { %1634 = vmatpush3.bf16.msra.mxu1 %v1809_v11  ;;  %1595 = vmatprep.subr.bf16.mxu0 %v1810_v12  ;;  %v1830_v32 = vld [vmem:[%s2299_s0] ss:$28 sps:$4 sm:$0xff]   ;;  %v1833_v34 = vld [vmem:[%s2299_s0 + $0x8] ss:$28 sps:$4 sm:$0xff]   ;;  %v1845_v43 = vld [vmem:[%s2299_s0 + $0x38] ss:$28 sps:$4 sm:$0xff]  }
   0xe   :  { %1635 = vmatprep.subr.bf16.mxu1 %v1811_v13  ;;  %v1832_v33 = vld [vmem:[%s2299_s0 + $0x4] ss:$28 sps:$4 sm:$0xff]   ;;  %v1835_v35 = vld [vmem:[%s2299_s0 + $0xc] ss:$28 sps:$4 sm:$0xff]   ;;  %v1841_v41 = vld [vmem:[%s2299_s0 + $0x3c] ss:$28 sps:$4 sm:$0xff]  }
   0xf   :  { %627 = vmatprep.mubr.bf16.mxu0 %v1832_v33  ;;  %692 = vmatprep.mubr.bf16.mxu1 %v1835_v35  ;;  %v1839_v39 = vld [vmem:[%s2298_s1 + $0x180] sm:$0xff]   ;;  %v1847_v45 = vld [vmem:[%s2298_s1 + $0x168] sm:$0xff]   ;;  %v1851_v49 = vld [vmem:[%s2299_s0 + $0x74] ss:$28 sps:$4 sm:$0xff]  }
  0x10   :  { %1596 = vmatpush3.bf16.msra.mxu0 %v1812_v14  ;;  %v1843_v42 = vld [vmem:[%s2299_s0 + $0x44] ss:$28 sps:$4 sm:$0xff]   ;;  %v1848_v46 = vld [vmem:[%s2298_s1 + $0x128] sm:$0xff]   ;;  %v1853_v50 = vld [vmem:[%s2299_s0 + $0x7c] ss:$28 sps:$4 sm:$0xff]  }
  0x11   :  { %1636 = vmatpush3.bf16.msra.mxu1 %v1813_v15  ;;  %1597 = vmatprep.subr.bf16.mxu0 %v1814_v16  ;;  %v1846_v44 = vld [vmem:[%s2299_s0 + $0x40] ss:$28 sps:$4 sm:$0xff]   ;;  %v1855_v51 = vld [vmem:[%s2299_s0 + $0x70] ss:$28 sps:$4 sm:$0xff]   ;;  %v1856_v52 = vld [vmem:[%s2299_s0 + $0x78] ss:$28 sps:$4 sm:$0xff]  }
  0x12   :  { %1637 = vmatprep.subr.bf16.mxu1 %v1815_v17  ;;  %v1849_v47 = vld [vmem:[%s2298_s1 + $0x160] sm:$0xff]   ;;  %v1857_v53 = vld [vmem:[%s2298_s1 + $0x158] sm:$0xff]   ;;  %v1859_v55 = vld [vmem:[%s2298_s1 + $0x150] sm:$0xff]  }
  0x13   :  { %v1850_v48 = vld [vmem:[%s2298_s1 + $0x120] sm:$0xff]   ;;  %v1858_v54 = vld [vmem:[%s2298_s1 + $0x118] sm:$0xff]   ;;  %v1860_v56 = vld [vmem:[%s2298_s1 + $0x110] sm:$0xff]  }
  0x14   :  { %1598 = vmatpush3.bf16.msra.mxu0 %v1816_v18  ;;  %v1861_v57 = vld [vmem:[%s2299_s0 + $0xac] ss:$28 sps:$4 sm:$0xff]   ;;  %v1863_v58 = vld [vmem:[%s2299_s0 + $0xb4] ss:$28 sps:$4 sm:$0xff]   ;;  %v1869_v63 = vld [vmem:[%s2298_s1 + $0x140] sm:$0xff]  }
  0x15   :  { %1638 = vmatpush3.bf16.msra.mxu1 %v1817_v19  ;;  %1599 = vmatprep.subr.bf16.mxu0 %v1818_v20  ;;  %v1865_v59 = vld [vmem:[%s2299_s0 + $0xa8] ss:$28 sps:$4 sm:$0xff]   ;;  %v1866_v61 = vld [vmem:[%s2299_s0 + $0xb0] ss:$28 sps:$4 sm:$0xff]   ;;  %v1874_v1 = vld [vmem:[%s2299_s0 + $0x18] ss:$28 sps:$4 sm:$0xff]  }
  0x16   :  { %1639 = vmatprep.subr.bf16.mxu1 %v1819_v21  ;;  %v1867_v60 = vld [vmem:[%s2298_s1 + $0x148] sm:$0xff]   ;;  %v1873_v0 = vld [vmem:[%s2299_s0 + $0x14] ss:$28 sps:$4 sm:$0xff]   ;;  %v1870_v2 = vld [vmem:[%s2298_s1 + $0x100] sm:$0xff]  }
  0x17   :  { %v1868_v62 = vld [vmem:[%s2298_s1 + $0x108] sm:$0xff]   ;;  %v1883_v8 = vld [vmem:[%s2299_s0 + $0xc0] ss:$28 sps:$4 sm:$0xff]   ;;  %v1886_v12 = vld [vmem:[%s2299_s0 + $0xb8] ss:$28 sps:$4 sm:$0xff]  }
  0x18   :  { %1600 = vmatpush3.bf16.msra.mxu0 %v1820_v22  ;;  %v1871_v3 = vld [vmem:[%s2299_s0 + $0x10] ss:$28 sps:$4 sm:$0xff]   ;;  %v1882_v6 = vld [vmem:[%s2299_s0 + $0x88] ss:$28 sps:$4 sm:$0xff]   ;;  %v1881_v10 = vld [vmem:[%s2299_s0 + $0x80] ss:$28 sps:$4 sm:$0xff]  }
  0x19   :  { %1640 = vmatpush3.bf16.msra.mxu1 %v1821_v23  ;;  %1601 = vmatprep.subr.bf16.mxu0 %v1822_v24  ;;  %v1875_v4 = vld [vmem:[%s2299_s0 + $0x50] ss:$28 sps:$4 sm:$0xff]   ;;  %v1878_v7 = vld [vmem:[%s2299_s0 + $0x48] ss:$28 sps:$4 sm:$0xff]   ;;  %v1884_v11 = vld [vmem:[%s2299_s0 + $0xbc] ss:$28 sps:$4 sm:$0xff]  }
  0x1a   :  { %1641 = vmatprep.subr.bf16.mxu1 %v1823_v25  ;;  %v1876_v5 = vld [vmem:[%s2299_s0 + $0x4c] ss:$28 sps:$4 sm:$0xff]   ;;  %v1879_v9 = vld [vmem:[%s2299_s0 + $0x84] ss:$28 sps:$4 sm:$0xff]   ;;  %v1887_v13 = vld [vmem:[%s2300_s2 + $0x38] sm:$0xff]  }
  0x1b   :  { %v1888_v14 = vld [vmem:[%s2300_s2 + $0x30] sm:$0xff]   ;;  %v1889_v15 = vld [vmem:[%s2300_s2 + $0x28] sm:$0xff]   ;;  %v1890_v16 = vld [vmem:[%s2300_s2 + $0x20] sm:$0xff]  }
  0x1c   :  { %1602 = vmatpush3.bf16.msra.mxu0 %v1824_v26  ;;  %v1891_v17 = vld [vmem:[%s2300_s2 + $0x18] sm:$0xff]   ;;  %v1892_v18 = vld [vmem:[%s2300_s2 + $0x10] sm:$0xff]   ;;  %v1893_v19 = vld [vmem:[%s2300_s2 + $0x8] sm:$0xff]  }
  0x1d   :  { %1642 = vmatpush3.bf16.msra.mxu1 %v1825_v27  ;;  %1603 = vmatprep.subr.bf16.mxu0 %v1826_v28  ;;  %v1894_v20 = vld [vmem:[%s2300_s2] sm:$0xff]  }
  0x1e   :  { %1643 = vmatprep.subr.bf16.mxu1 %v1827_v29 }
  0x20   :  { %1604 = vmatpush3.bf16.msra.mxu0 %v1828_v30 }
  0x21   :  { %1644 = vmatpush3.bf16.msra.mxu1 %v1829_v31  ;;  %1669 = vmatprep.subr.bf16.mxu0 %v1836_v36 }
  0x22   :  { %1738 = vmatprep.subr.bf16.mxu1 %v1839_v39 }
  0x23   :  { %628 = vmatmul.mubr.bf16.vlgmr.msra.gmra.mxu0 %v1830_v32 }
  0x24   :  { %693 = vmatmul.mubr.bf16.vlgmr.msra.gmra.mxu1 %v1833_v34  ;;  %1670 = vmatpush3.bf16.msra.mxu0 %v1837_v37 }
  0x25   :  { %1671 = vmatprep.subr.bf16.mxu0 %v1838_v38  ;;  %1739 = vmatpush3.bf16.msra.mxu1 %v1839_v39 }
  0x26   :  { %635 = vmatprep.mubr.bf16.mxu0 %v1841_v41  ;;  %700 = vmatprep.mubr.bf16.mxu1 %v1843_v42 }
  0x28   :  { %1672 = vmatpush3.bf16.msra.mxu0 %v1840_v40 }
  0x29   :  { %1673 = vmatprep.subr.bf16.mxu0 %v1847_v45 }
  0x2b   :  { %636 = vmatmul.mubr.bf16.gmra.mxu0 %v1845_v43 }
  0x2c   :  { %701 = vmatmul.mubr.bf16.gmra.mxu1 %v1846_v44  ;;  %1674 = vmatpush3.bf16.msra.mxu0 %v1848_v46 }
  0x2d   :  { %1675 = vmatprep.subr.bf16.mxu0 %v1849_v47  ;;  %643 = vmatprep.mubr.bf16.mxu0 %v1851_v49 }
  0x2e   :  { %708 = vmatprep.mubr.bf16.mxu1 %v1853_v50 }
  0x30   :  { %1676 = vmatpush3.bf16.msra.mxu0 %v1850_v48 }
  0x31   :  { %1677 = vmatprep.subr.bf16.mxu0 %v1857_v53 }
  0x33   :  { %644 = vmatmul.mubr.bf16.gmra.mxu0 %v1855_v51 }
  0x34   :  { %709 = vmatmul.mubr.bf16.gmra.mxu1 %v1856_v52  ;;  %1678 = vmatpush3.bf16.msra.mxu0 %v1858_v54 }
  0x35   :  { %1679 = vmatprep.subr.bf16.mxu0 %v1859_v55  ;;  %651 = vmatprep.mubr.bf16.mxu0 %v1861_v57 }
  0x36   :  { %716 = vmatprep.mubr.bf16.mxu1 %v1863_v58 }
  0x38   :  { %1680 = vmatpush3.bf16.msra.mxu0 %v1860_v56 }
  0x39   :  { %1681 = vmatprep.subr.bf16.mxu0 %v1867_v60 }
  0x3b   :  { %652 = vmatmul.mubr.bf16.gmra.mxu0 %v1865_v59 }
  0x3c   :  { %717 = vmatmul.mubr.bf16.gmra.mxu1 %v1866_v61  ;;  %1682 = vmatpush3.bf16.msra.mxu0 %v1868_v62 }
  0x3d   :  { %757 = vmatprep.mubr.bf16.mxu0 %v1873_v0  ;;  %1683 = vmatprep.subr.bf16.mxu0 %v1869_v63 }
  0x3e   :  { %1740 = vmatprep.mubr.msk.bf16.mxu1 %vm582_vm0, %v1874_v1 }
  0x40   :  { %1684 = vmatpush3.bf16.msra.mxu0 %v1870_v2 }
  0x41   :  { %1748 = vmatprep.subr.bf16.mxu0 %v1887_v13 }
  0x43   :  { %758 = vmatmul.mubr.bf16.vlgmr.msra.gmra.mxu0 %v1871_v3 }
  0x44   :  { %1741 = vmatmul.mubr.msk.bf16.vlgmr.msra.gmra.mxu1 %vm582_vm0, %v1875_v4  ;;  %765 = vmatprep.mubr.bf16.mxu0 %v1876_v5 }
  0x45   :  { %1744 = vmatprep.mubr.msk.bf16.mxu1 %vm582_vm0, %v1882_v6  ;;  %1749 = vmatpush3.bf16.msra.mxu0 %v1887_v13 }
  0x46   :  { %1750 = vmatprep.subr.bf16.mxu0 %v1888_v14 }
  0x49   :  { %1751 = vmatpush3.bf16.msra.mxu0 %v1888_v14 }
  0x4a   :  { %1752 = vmatprep.subr.bf16.mxu0 %v1889_v15 }
  0x4b   :  { %766 = vmatmul.mubr.bf16.gmra.mxu0 %v1878_v7 }
  0x4c   :  { %1745 = vmatmul.mubr.msk.bf16.gmra.mxu1 %vm582_vm0, %v1883_v8  ;;  %773 = vmatprep.mubr.bf16.mxu0 %v1879_v9 }
  0x4d   :  { %1753 = vmatpush3.bf16.msra.mxu0 %v1889_v15 }
  0x4e   :  { %1754 = vmatprep.subr.bf16.mxu0 %v1890_v16 }
  0x51   :  { %1755 = vmatpush3.bf16.msra.mxu0 %v1890_v16  ;;  %v1903_v16 = vmov 0.0  }
  0x52   :  { %1756 = vmatprep.subr.bf16.mxu0 %v1891_v17 }
  0x53   :  { %774 = vmatmul.mubr.bf16.gmra.mxu0 %v1881_v10 }
  0x54   :  { %781 = vmatprep.mubr.bf16.mxu0 %v1884_v11 }
  0x55   :  { %1757 = vmatpush3.bf16.msra.mxu0 %v1891_v17 }
  0x56   :  { %1758 = vmatprep.subr.bf16.mxu0 %v1892_v18 }
  0x59   :  { %1759 = vmatpush3.bf16.msra.mxu0 %v1892_v18 }
  0x5a   :  { %1760 = vmatprep.subr.bf16.mxu0 %v1893_v19 }
  0x5b   :  { %782 = vmatmul.mubr.bf16.gmra.mxu0 %v1886_v12 }
  0x5d   :  { %1761 = vmatpush3.bf16.msra.mxu0 %v1893_v19 }
  0x5e   :  { %1762 = vmatprep.subr.bf16.mxu0 %v1894_v20 }
  0x61   :  { %1763 = vmatpush3.bf16.msra.mxu0 %v1894_v20 }
  0xe3   :  { %v1605_v21 = vpop.f32.mrf.mxu0 }
  0xe4   :  { %v1645_v22 = vpop.f32.mrf.mxu1 }
  0xe5   :  { %v1606_v23 = vpop.f32.mrf.mxu0 }
  0xe6   :  { %v1646_v24 = vpop.f32.mrf.mxu1  ;;  %v1607_v54 = vadd.f32 %v1606_v23, %v1605_v21 }
  0xe7   :  { %v1608_v25 = vpop.f32.mrf.mxu0  ;;  %v1647_v55 = vadd.f32 %v1646_v24, %v1645_v22 }
  0xe8   :  { %v1648_v26 = vpop.f32.mrf.mxu1 }
  0xe9   :  { %v1609_v27 = vpop.f32.mrf.mxu0  ;;  %v695_v62 = vadd.f32 %v1647_v55, %v1607_v54 }
  0xea   :  { %v1649_v28 = vpop.f32.mrf.mxu1  ;;  %v1610_v63 = vadd.f32 %v1609_v27, %v1608_v25 }
  0xeb   :  { %v1611_v29 = vpop.f32.mrf.mxu0  ;;  %v1650_v0 = vadd.f32 %v1649_v28, %v1648_v26 }
  0xec   :  { %v1651_v30 = vpop.f32.mrf.mxu1 }
  0xed   :  { %v1612_v31 = vpop.f32.mrf.mxu0  ;;  %v698_v8 = vadd.f32 %v1650_v0, %v1610_v63 }
  0xee   :  { %v1652_v32 = vpop.f32.mrf.mxu1  ;;  %v1613_v4 = vadd.f32 %v1612_v31, %v1611_v29 }
  0xef   :  { %v1614_v33 = vpop.f32.mrf.mxu0  ;;  %v1653_v5 = vadd.f32 %v1652_v32, %v1651_v30 }
  0xf0   :  { %v1654_v34 = vpop.f32.mrf.mxu1 }
  0xf1   :  { %v1615_v35 = vpop.f32.mrf.mxu0  ;;  %v703_v13 = vadd.f32 %v1653_v5, %v1613_v4 }
  0xf2   :  { %v1655_v36 = vpop.f32.mrf.mxu1  ;;  %v1616_v14 = vadd.f32 %v1615_v35, %v1614_v33 }
  0xf3   :  { %v1617_v37 = vpop.f32.mrf.mxu0  ;;  %v1656_v15 = vadd.f32 %v1655_v36, %v1654_v34 }
  0xf4   :  { %v1657_v38 = vpop.f32.mrf.mxu1 }
  0xf5   :  { %v1618_v39 = vpop.f32.mrf.mxu0  ;;  %v706_v29 = vadd.f32 %v1656_v15, %v1616_v14 }
  0xf6   :  { %v1658_v40 = vpop.f32.mrf.mxu1  ;;  %v1619_v30 = vadd.f32 %v1618_v39, %v1617_v37 }
  0xf7   :  { %v2189_v41 = vpop.f32.mrf.mxu0  ;;  %v1659_v31 = vadd.f32 %v1658_v40, %v1657_v38 }
  0xf8   :  { %v2191_v42 = vpop.f32.mrf.mxu1 }
  0xf9   :  { %v2193_v43 = vpop.f32.mrf.mxu0  ;;  %v711_v54 = vadd.f32 %v1659_v31, %v1619_v30 }
  0xfa   :  { %v2195_v44 = vpop.f32.mrf.mxu1  ;;  %v1622_v55 = vadd.f32 %v2193_v43, %v2189_v41 }
  0xfb   :  { %v2197_v45 = vpop.f32.mrf.mxu0 }
  0xfc   :  { %v2199_v46 = vpop.f32.mrf.mxu1 }
  0xfd   :  { %v2201_v47 = vpop.f32.mrf.mxu0 }
  0xfe   :  { %v2203_v48 = vpop.f32.mrf.mxu1 }
  0xff   :  { %v1626_v49 = vpop.f32.mrf.mxu0 }
 0x100   :  { %v1666_v50 = vpop.f32.mrf.mxu1 }
 0x101   :  { %v1627_v51 = vpop.f32.mrf.mxu0 }
 0x102   :  { %v1628_v52 = vadd.f32 %v1627_v51, %v1626_v49  ;;  %v1667_v53 = vpop.f32.mrf.mxu1 }
 0x103   :  { %v1668_v56 = vadd.f32 %v1667_v53, %v1666_v50  ;;  %v1685_v57 = vpop.f32.mrf.mxu0 }
 0x104   :  { %v1742_v58 = vpop.f32.mrf.mxu1 }
 0x105   :  { %v2205_v59 = vadd.f32 %v1668_v56, %v1628_v52  ;;  %v1686_v60 = vpop.f32.mrf.mxu0  ;;  %v1662_v56 = vadd.f32 %v2195_v44, %v2191_v42  ;;  %v1625_v42 = vadd.f32 %v2201_v47, %v2197_v45  ;;  %v1665_v44 = vadd.f32 %v2203_v48, %v2199_v46 }
 0x106   :  { %v824_v61 = vpop.f32.mrf.mxu1  ;;  %v1687_v1 = vadd.f32 %v1686_v60, %v1685_v57 }
 0x107   :  { %v1688_v2 = vpop.f32.mrf.mxu0  ;;  %v714_v43 = vadd.f32 %v1662_v56, %v1622_v55 }
 0x108   :  { %v760_v3 = vadd.f32 %v1687_v1, %v695_v62  ;;  %v1743_v6 = vpop.f32.mrf.mxu1  ;;  %v1904_v62 = vmov 1.0|1.0  }
 0x109   :  { %v1689_v7 = vpop.f32.mrf.mxu0 }
 0x10a   :  { %v825_v9 = vadd.f32 %v824_v61, %v760_v3  ;;  %v1690_v10 = vadd.f32 %v1689_v7, %v1688_v2  ;;  %v827_v18 = vpop.f32.mrf.mxu1 }
 0x10b   :  { %v1691_v11 = vpop.f32.mrf.mxu0 }
 0x10c   :  { %vm866_vm1 = vcmp.ge.f32.partialorder %v825_v9, 1.0  ;;  %v763_v12 = vadd.f32 %v1690_v10, %v698_v8  ;;  %v874_v22 = vmul.f32 0.9, %v825_v9  ;;  %v1746_v25 = vpop.f32.mrf.mxu1  ;;  %v719_v10 = vadd.f32 %v1665_v44, %v1625_v42  ;;  %v1902_v42 = vld [vmem:[%s2301_s3] sm:$0xff]  }
 0x10d   :  { %v1519_v17 = vsel %vm866_vm1, 1.0, %v1903_v16  ;;  %v1692_v19 = vpop.f32.mrf.mxu0 }
 0x10e   :  { %v870_v20 = vsub.f32 1.0, %v1519_v17  ;;  %v828_v21 = vadd.f32 %v827_v18, %v763_v12  ;;  %v1693_v23 = vadd.f32 %v1692_v19, %v1691_v11  ;;  %v840_v50 = vpop.f32.mrf.mxu1 }
 0x10f   :  { %v1694_v24 = vpop.f32.mrf.mxu0 }
 0x110   :  { %v871_v26 = vmul.f32 %v870_v20, %v825_v9  ;;  %v875_v27 = vadd.f32 %v874_v22, %v828_v21  ;;  %v768_v28 = vadd.f32 %v1693_v23, %v703_v13  ;;  %v1747_v60 = vpop.f32.mrf.mxu1 }
 0x111   :  { %v1695_v32 = vpop.f32.mrf.mxu0 }
 0x112   :  { %v876_v33 = vmul.f32 0.9, %v871_v26  ;;  %v886_v34 = vmul.f32 0.9, %v875_v27  ;;  %v833_v35 = vadd.f32 %v1742_v58, %v768_v28  ;;  %v1696_v36 = vadd.f32 %v1695_v32, %v1694_v24 }
 0x113   :  { %v1697_v49 = vpop.f32.mrf.mxu0 }
 0x114   :  { %v877_v51 = vadd.f32 %v876_v33, %v875_v27  ;;  %v887_v52 = vadd.f32 %v886_v34, %v833_v35  ;;  %v771_v53 = vadd.f32 %v1696_v36, %v706_v29 }
 0x115   :  { %v1698_v57 = vpop.f32.mrf.mxu0 }
 0x116   :  { %v836_v37 = vadd.f32 %v1743_v6, %v771_v53  ;;  %v1699_v38 = vadd.f32 %v1698_v57, %v1697_v49  ;;  %vm878_vm2 = vcmp.ge.f32.partialorder %v877_v51, 1.0  ;;  %v898_v39 = vmul.f32 0.9, %v887_v52  ;;  %v843_v6 = vpop.f32.mrf.mxu1 }
 0x117   :  { %v1700_v40 = vpop.f32.mrf.mxu0  ;;  %v1520_v58 = vsel %vm878_vm2, 1.0, %v1903_v16  ;;  %vm1573_vm3 = vmpackc.low %vm878_vm2, %vm866_vm1 }
 0x118   :  { %v882_v61 = vsub.f32 1.0, %v1520_v58  ;;  %1764 = vmatprep.mubr.msk.bf16.mxu0 %vm1573_vm3, %v1904_v62  ;;  %v776_v63 = vadd.f32 %v1699_v38, %v711_v54  ;;  %v899_v41 = vadd.f32 %v898_v39, %v836_v37  ;;  %v1896_v58 = vld [vmem:[%s2301_s3 + $0x30] sm:$0xff]  }
 0x119   :  { %v1701_v0 = vpop.f32.mrf.mxu0 }
 0x11a   :  { %v883_v1 = vmul.f32 %v882_v61, %v877_v51  ;;  %v1702_v2 = vadd.f32 %v1701_v0, %v1700_v40  ;;  %v841_v3 = vadd.f32 %v840_v50, %v776_v63  ;;  %v910_v4 = vmul.f32 0.9, %v899_v41  ;;  %v1895_v40 = vld [vmem:[%s2301_s3 + $0x38] sm:$0xff]   ;;  %v1898_v61 = vld [vmem:[%s2301_s3 + $0x20] sm:$0xff]  }
 0x11b   :  { %v1703_v5 = vpop.f32.mrf.mxu0  ;;  %1772 = vmatprep.subr.bf16.mxu1 %v1895_v40  ;;  %v1899_v63 = vld [vmem:[%s2301_s3 + $0x18] sm:$0xff]  }
 0x11c   :  { %v888_v7 = vmul.f32 0.9, %v883_v1  ;;  %v911_v8 = vadd.f32 %v910_v4, %v841_v3  ;;  %v779_v9 = vadd.f32 %v1702_v2, %v714_v43  ;;  %1773 = vmatpush3.bf16.msra.mxu1 %v1895_v40  ;;  %v1901_v43 = vld [vmem:[%s2301_s3 + $0x8] sm:$0xff]  }
 0x11d   :  { %v1704_v11 = vpop.f32.mrf.mxu0  ;;  %1774 = vmatprep.subr.bf16.mxu1 %v1896_v58 }
 0x11e   :  { %v889_v12 = vadd.f32 %v888_v7, %v887_v52  ;;  %v1705_v13 = vadd.f32 %v1704_v11, %v1703_v5  ;;  %v844_v14 = vadd.f32 %v843_v6, %v779_v9  ;;  %v922_v15 = vmul.f32 0.9, %v911_v8 }
 0x11f   :  { %v1706_v45 = vpop.f32.mrf.mxu0 }
 0x120   :  { %vm890_vm4 = vcmp.ge.f32.partialorder %v889_v12, 1.0  ;;  %v784_v47 = vadd.f32 %v1705_v13, %v719_v10  ;;  %v923_v46 = vadd.f32 %v922_v15, %v844_v14  ;;  %1775 = vmatpush3.bf16.msra.mxu1 %v1896_v58 }
 0x121   :  { %v1521_v48 = vsel %vm890_vm4, 1.0, %v1903_v16  ;;  %v1707_v17 = vpop.f32.mrf.mxu0 }
 0x122   :  { %v894_v18 = vsub.f32 1.0, %v1521_v48  ;;  %v849_v19 = vadd.f32 %v1746_v25, %v784_v47  ;;  %v934_v20 = vmul.f32 0.9, %v923_v46  ;;  %v1708_v21 = vadd.f32 %v1707_v17, %v1706_v45 }
 0x124   :  { %v895_v22 = vmul.f32 %v894_v18, %v889_v12  ;;  %v935_v23 = vadd.f32 %v934_v20, %v849_v19  ;;  %v787_v24 = vadd.f32 %v1708_v21, %v2205_v59 }
 0x126   :  { %v900_v26 = vmul.f32 0.9, %v895_v22  ;;  %v852_v27 = vadd.f32 %v1747_v60, %v787_v24  ;;  %v946_v28 = vmul.f32 0.9, %v935_v23  ;;  %v1897_v60 = vld [vmem:[%s2301_s3 + $0x28] sm:$0xff]  }
 0x127   :  { %1776 = vmatprep.subr.bf16.mxu1 %v1897_v60 }
 0x128   :  { %v901_v29 = vadd.f32 %v900_v26, %v899_v41  ;;  %v947_v30 = vadd.f32 %v946_v28, %v852_v27  ;;  %1777 = vmatpush3.bf16.msra.mxu1 %v1897_v60  ;;  %v1900_v41 = vld [vmem:[%s2301_s3 + $0x10] sm:$0xff]  }
 0x129   :  { %1778 = vmatprep.subr.bf16.mxu1 %v1898_v61 }
 0x12a   :  { %vm902_vm5 = vcmp.ge.f32.partialorder %v901_v29, 1.0 }
 0x12b   :  { %v1522_v31 = vsel %vm902_vm5, 1.0, %v1903_v16  ;;  %vm1575_vm6 = vmpackc.low %vm902_vm5, %vm890_vm4 }
 0x12c   :  { %v906_v32 = vsub.f32 1.0, %v1522_v31  ;;  %1765 = vmatmul.mubr.msk.bf16.vlgmr.msra.gmra.mxu0 %vm1575_vm6, %v1904_v62  ;;  %1779 = vmatpush3.bf16.msra.mxu1 %v1898_v61 }
 0x12d   :  { %1780 = vmatprep.subr.bf16.mxu1 %v1899_v63 }
 0x12e   :  { %v907_v25 = vmul.f32 %v906_v32, %v901_v29 }
 0x130   :  { %v912_v33 = vmul.f32 0.9, %v907_v25  ;;  %1781 = vmatpush3.bf16.msra.mxu1 %v1899_v63 }
 0x131   :  { %1782 = vmatprep.subr.bf16.mxu1 %v1900_v41 }
 0x132   :  { %v913_v34 = vadd.f32 %v912_v33, %v911_v8 }
 0x134   :  { %vm914_vm7 = vcmp.ge.f32.partialorder %v913_v34, 1.0  ;;  %1783 = vmatpush3.bf16.msra.mxu1 %v1900_v41 }
 0x135   :  { %v1523_v35 = vsel %vm914_vm7, 1.0, %v1903_v16  ;;  %1784 = vmatprep.subr.bf16.mxu1 %v1901_v43 }
 0x136   :  { %v918_v59 = vsub.f32 1.0, %v1523_v35 }
 0x138   :  { %v919_v36 = vmul.f32 %v918_v59, %v913_v34  ;;  %1785 = vmatpush3.bf16.msra.mxu1 %v1901_v43 }
 0x139   :  { %1786 = vmatprep.subr.bf16.mxu1 %v1902_v42 }
 0x13a   :  { %v924_v49 = vmul.f32 0.9, %v919_v36 }
 0x13c   :  { %v925_v50 = vadd.f32 %v924_v49, %v923_v46  ;;  %1787 = vmatpush3.bf16.msra.mxu1 %v1902_v42 }
 0x13e   :  { %vm926_vm8 = vcmp.ge.f32.partialorder %v925_v50, 1.0 }
 0x13f   :  { %v1524_v51 = vsel %vm926_vm8, 1.0, %v1903_v16  ;;  %vm1577_vm9 = vmpackc.low %vm926_vm8, %vm914_vm7 }
 0x140   :  { %v930_v52 = vsub.f32 1.0, %v1524_v51  ;;  %1768 = vmatprep.mubr.msk.bf16.mxu0 %vm1577_vm9, %v1904_v62 }
 0x142   :  { %v931_v53 = vmul.f32 %v930_v52, %v925_v50 }
 0x144   :  { %v936_v54 = vmul.f32 0.9, %v931_v53 }
 0x146   :  { %v937_v55 = vadd.f32 %v936_v54, %v935_v23 }
 0x148   :  { %vm938_vm10 = vcmp.ge.f32.partialorder %v937_v55, 1.0 }
 0x149   :  { %v1525_v56 = vsel %vm938_vm10, 1.0, %v1903_v16 }
 0x14a   :  { %v942_v57 = vsub.f32 1.0, %v1525_v56 }
 0x14c   :  { %v943_v37 = vmul.f32 %v942_v57, %v937_v55 }
 0x14e   :  { %v948_v38 = vmul.f32 0.9, %v943_v37 }
 0x150   :  { %v949_v39 = vadd.f32 %v948_v38, %v947_v30 }
 0x152   :  { %vm950_vm11 = vcmp.ge.f32.partialorder %v949_v39, 1.0 }
 0x153   :  { %vm1579_vm12 = vmpackc.low %vm950_vm11, %vm938_vm10 }
 0x154   :  { %1769 = vmatmul.mubr.msk.bf16.gmra.mxu0 %vm1579_vm12, %v1904_v62 }
 0x1ec   :  { %v1766_v44 = vpop.f32.mrf.mxu0 }
 0x1ee   :  { %v1064_v0 = vpop.f32.mrf.mxu0 }
 0x1ef   :  { %vm1106_vm13 = vcmp.ge.f32.partialorder %v1064_v0, 1.0  ;;  %v1114_v6 = vmul.f32 0.9, %v1064_v0 }
 0x1f0   :  { %v1535_v1 = vsel %vm1106_vm13, 1.0, %v1903_v16  ;;  %v1767_v2 = vpop.f32.mrf.mxu0 }
 0x1f1   :  { %v1110_v3 = vsub.f32 1.0, %v1535_v1 }
 0x1f2   :  { %v1067_v4 = vpop.f32.mrf.mxu0 }
 0x1f3   :  { %v1111_v5 = vmul.f32 %v1110_v3, %v1064_v0  ;;  %v1115_v8 = vadd.f32 %v1114_v6, %v1067_v4 }
 0x1f5   :  { %v1116_v7 = vmul.f32 0.9, %v1111_v5  ;;  %v1126_v12 = vmul.f32 0.9, %v1115_v8 }
 0x1f7   :  { %v1117_v9 = vadd.f32 %v1116_v7, %v1115_v8  ;;  %v1127_v14 = vadd.f32 %v1766_v44, %v1126_v12 }
 0x1f9   :  { %vm1118_vm14 = vcmp.ge.f32.partialorder %v1117_v9, 1.0  ;;  %v1138_v48 = vmul.f32 0.9, %v1127_v14 }
 0x1fa   :  { %v1536_v10 = vsel %vm1118_vm14, 1.0, %v1903_v16  ;;  %vm1581_vm15 = vmpackc.low %vm1118_vm14, %vm1106_vm13 }
 0x1fb   :  { %v1122_v11 = vsub.f32 1.0, %v1536_v10  ;;  %1788 = vmatprep.mubr.msk.bf16.mxu1 %vm1581_vm15, %v1904_v62  ;;  %v1139_v18 = vadd.f32 %v1767_v2, %v1138_v48 }
 0x1fd   :  { %v1123_v13 = vmul.f32 %v1122_v11, %v1117_v9  ;;  %v1150_v26 = vmul.f32 0.9, %v1139_v18 }
 0x1ff   :  { %v1128_v15 = vmul.f32 0.9, %v1123_v13 }
 0x201   :  { %v1129_v45 = vadd.f32 %v1128_v15, %v1127_v14 }
 0x203   :  { %vm1130_vm0 = vcmp.ge.f32.partialorder %v1129_v45, 1.0 }
 0x204   :  { %v1537_v47 = vsel %vm1130_vm0, 1.0, %v1903_v16 }
 0x205   :  { %v1134_v46 = vsub.f32 1.0, %v1537_v47 }
 0x207   :  { %v1135_v17 = vmul.f32 %v1134_v46, %v1129_v45 }
 0x209   :  { %v1140_v19 = vmul.f32 0.9, %v1135_v17 }
 0x20b   :  { %v1141_v20 = vadd.f32 %v1140_v19, %v1139_v18 }
 0x20d   :  { %vm1142_vm1 = vcmp.ge.f32.partialorder %v1141_v20, 1.0 }
 0x20e   :  { %vm1583_vm2 = vmpackc.low %vm1142_vm1, %vm1130_vm0  ;;  %v1538_v21 = vsel %vm1142_vm1, 1.0, %v1903_v16 }
 0x20f   :  { %1789 = vmatmul.mubr.msk.bf16.vlgmr.msra.gmra.mxu1 %vm1583_vm2, %v1904_v62  ;;  %v1146_v22 = vsub.f32 1.0, %v1538_v21 }
 0x211   :  { %v1147_v23 = vmul.f32 %v1146_v22, %v1141_v20 }
 0x213   :  { %v1152_v29 = vmul.f32 0.9, %v1147_v23 }
 0x214   :  { %v1770_v24 = vpop.f32.mrf.mxu0 }
 0x216   :  { %v1080_v27 = vpop.f32.mrf.mxu0 }
 0x217   :  { %v1151_v28 = vadd.f32 %v1150_v26, %v1080_v27 }
 0x218   :  { %v1771_v31 = vpop.f32.mrf.mxu0 }
 0x219   :  { %v1153_v30 = vadd.f32 %v1152_v29, %v1151_v28  ;;  %v1162_v33 = vmul.f32 0.9, %v1151_v28 }
 0x21a   :  { %v1083_v34 = vpop.f32.mrf.mxu0 }
 0x21b   :  { %vm1154_vm3 = vcmp.ge.f32.partialorder %v1153_v30, 1.0  ;;  %v1163_v59 = vadd.f32 %v1162_v33, %v1083_v34 }
 0x21c   :  { %v1539_v32 = vsel %vm1154_vm3, 1.0, %v1903_v16 }
 0x21d   :  { %v1158_v25 = vsub.f32 1.0, %v1539_v32  ;;  %v1174_v52 = vmul.f32 0.9, %v1163_v59 }
 0x21f   :  { %v1159_v35 = vmul.f32 %v1158_v25, %v1153_v30  ;;  %v1175_v54 = vadd.f32 %v1770_v24, %v1174_v52 }
 0x221   :  { %v1164_v36 = vmul.f32 0.9, %v1159_v35  ;;  %v1186_v37 = vmul.f32 0.9, %v1175_v54 }
 0x223   :  { %v1165_v49 = vadd.f32 %v1164_v36, %v1163_v59  ;;  %v1187_v40 = vadd.f32 %v1771_v31, %v1186_v37 }
 0x225   :  { %vm1166_vm4 = vcmp.ge.f32.partialorder %v1165_v49, 1.0 }
 0x226   :  { %v1540_v50 = vsel %vm1166_vm4, 1.0, %v1903_v16  ;;  %vm1585_vm5 = vmpackc.low %vm1166_vm4, %vm1154_vm3 }
 0x227   :  { %v1170_v51 = vsub.f32 1.0, %v1540_v50  ;;  %1792 = vmatprep.mubr.msk.bf16.mxu1 %vm1585_vm5, %v1904_v62 }
 0x229   :  { %v1171_v53 = vmul.f32 %v1170_v51, %v1165_v49 }
 0x22b   :  { %v1176_v55 = vmul.f32 0.9, %v1171_v53 }
 0x22d   :  { %v1177_v56 = vadd.f32 %v1176_v55, %v1175_v54 }
 0x22f   :  { %vm1178_vm6 = vcmp.ge.f32.partialorder %v1177_v56, 1.0 }
 0x230   :  { %v1541_v57 = vsel %vm1178_vm6, 1.0, %v1903_v16 }
 0x231   :  { %v1182_v38 = vsub.f32 1.0, %v1541_v57 }
 0x233   :  { %v1183_v39 = vmul.f32 %v1182_v38, %v1177_v56 }
 0x235   :  { %v1188_v58 = vmul.f32 0.9, %v1183_v39 }
 0x237   :  { %v1189_v60 = vadd.f32 %v1188_v58, %v1187_v40 }
 0x239   :  { %vm1190_vm7 = vcmp.ge.f32.partialorder %v1189_v60, 1.0 }
 0x23a   :  { %vm1587_vm8 = vmpackc.low %vm1190_vm7, %vm1178_vm6 }
 0x23b   :  { %1793 = vmatmul.mubr.msk.bf16.gmra.mxu1 %vm1587_vm8, %v1904_v62 }
 0x2cf   :  { %v1790_v61 = vpop.f32.mrf.mxu1 }
 0x2d1   :  { %v1304_v63 = vpop.f32.mrf.mxu1 }
 0x2d2   :  { %vm1346_vm9 = vcmp.ge.f32.partialorder %v1304_v63, 1.0  ;;  %v1354_v1 = vmul.f32 0.9, %v1304_v63 }
 0x2d3   :  { %v1551_v41 = vsel %vm1346_vm9, 1.0, %v1903_v16  ;;  %v1791_v43 = vpop.f32.mrf.mxu1 }
 0x2d4   :  { %1349 = vst [vmem:[%s2302_s4] sm:$0xff] %v1551_v41  ;;  %v1350_v42 = vsub.f32 1.0, %v1551_v41 }
 0x2d5   :  { %v1307_v44 = vpop.f32.mrf.mxu1 }
 0x2d6   :  { %v1351_v0 = vmul.f32 %v1350_v42, %v1304_v63  ;;  %v1355_v3 = vadd.f32 %v1354_v1, %v1307_v44 }
 0x2d8   :  { %v1356_v2 = vmul.f32 0.9, %v1351_v0  ;;  %v1366_v6 = vmul.f32 0.9, %v1355_v3 }
 0x2da   :  { %v1357_v4 = vadd.f32 %v1356_v2, %v1355_v3  ;;  %v1367_v8 = vadd.f32 %v1790_v61, %v1366_v6 }
 0x2dc   :  { %vm1358_vm10 = vcmp.ge.f32.partialorder %v1357_v4, 1.0  ;;  %v1378_v13 = vmul.f32 0.9, %v1367_v8 }
 0x2dd   :  { %v1553_v62 = vsel %vm1358_vm10, 1.0, %v1903_v16 }
 0x2de   :  { %1554 = vst [vmem:[%s2302_s4 + $0x8] sm:$0xff] %v1553_v62  ;;  %v1362_v5 = vsub.f32 1.0, %v1553_v62  ;;  %v1379_v45 = vadd.f32 %v1791_v43, %v1378_v13 }
 0x2e0   :  { %v1363_v7 = vmul.f32 %v1362_v5, %v1357_v4  ;;  %v1390_v19 = vmul.f32 0.9, %v1379_v45 }
 0x2e2   :  { %v1368_v9 = vmul.f32 0.9, %v1363_v7 }
 0x2e4   :  { %v1369_v10 = vadd.f32 %v1368_v9, %v1367_v8 }
 0x2e6   :  { %vm1370_vm11 = vcmp.ge.f32.partialorder %v1369_v10, 1.0 }
 0x2e7   :  { %v1556_v11 = vsel %vm1370_vm11, 1.0, %v1903_v16 }
 0x2e8   :  { %1557 = vst [vmem:[%s2302_s4 + $0x10] sm:$0xff] %v1556_v11  ;;  %v1374_v12 = vsub.f32 1.0, %v1556_v11 }
 0x2ea   :  { %v1375_v14 = vmul.f32 %v1374_v12, %v1369_v10 }
 0x2ec   :  { %v1380_v15 = vmul.f32 0.9, %v1375_v14 }
 0x2ee   :  { %v1381_v47 = vadd.f32 %v1380_v15, %v1379_v45 }
 0x2f0   :  { %vm1382_vm12 = vcmp.ge.f32.partialorder %v1381_v47, 1.0 }
 0x2f1   :  { %v1559_v46 = vsel %vm1382_vm12, 1.0, %v1903_v16 }
 0x2f2   :  { %1560 = vst [vmem:[%s2302_s4 + $0x18] sm:$0xff] %v1559_v46  ;;  %v1386_v48 = vsub.f32 1.0, %v1559_v46 }
 0x2f4   :  { %v1387_v17 = vmul.f32 %v1386_v48, %v1381_v47 }
 0x2f6   :  { %v1392_v22 = vmul.f32 0.9, %v1387_v17 }
 0x2fb   :  { %v1794_v18 = vpop.f32.mrf.mxu1 }
 0x2fd   :  { %v1320_v20 = vpop.f32.mrf.mxu1 }
 0x2fe   :  { %v1391_v21 = vadd.f32 %v1390_v19, %v1320_v20 }
 0x2ff   :  { %v1795_v24 = vpop.f32.mrf.mxu1 }
 0x300   :  { %v1393_v23 = vadd.f32 %v1392_v22, %v1391_v21  ;;  %v1402_v28 = vmul.f32 0.9, %v1391_v21 }
 0x301   :  { %v1323_v29 = vpop.f32.mrf.mxu1 }
 0x302   :  { %vm1394_vm13 = vcmp.ge.f32.partialorder %v1393_v23, 1.0  ;;  %v1403_v32 = vadd.f32 %v1402_v28, %v1323_v29 }
 0x303   :  { %v1562_v26 = vsel %vm1394_vm13, 1.0, %v1903_v16 }
 0x304   :  { %1563 = vst [vmem:[%s2302_s4 + $0x20] sm:$0xff] %v1562_v26  ;;  %v1398_v27 = vsub.f32 1.0, %v1562_v26  ;;  %v1414_v35 = vmul.f32 0.9, %v1403_v32 }
 0x306   :  { %v1399_v30 = vmul.f32 %v1398_v27, %v1393_v23  ;;  %v1415_v36 = vadd.f32 %v1794_v18, %v1414_v35 }
 0x308   :  { %v1404_v31 = vmul.f32 0.9, %v1399_v30  ;;  %v1426_v53 = vmul.f32 0.9, %v1415_v36 }
 0x30a   :  { %v1405_v25 = vadd.f32 %v1404_v31, %v1403_v32  ;;  %v1427_v55 = vadd.f32 %v1795_v24, %v1426_v53 }
 0x30c   :  { %vm1406_vm14 = vcmp.ge.f32.partialorder %v1405_v25, 1.0 }
 0x30d   :  { %v1565_v33 = vsel %vm1406_vm14, 1.0, %v1903_v16 }
 0x30e   :  { %1566 = vst [vmem:[%s2302_s4 + $0x28] sm:$0xff] %v1565_v33  ;;  %v1410_v34 = vsub.f32 1.0, %v1565_v33 }
 0x310   :  { %v1411_v59 = vmul.f32 %v1410_v34, %v1405_v25 }
 0x312   :  { %v1416_v49 = vmul.f32 0.9, %v1411_v59 }
 0x314   :  { %v1417_v50 = vadd.f32 %v1416_v49, %v1415_v36 }
 0x316   :  { %vm1418_vm15 = vcmp.ge.f32.partialorder %v1417_v50, 1.0 }
 0x317   :  { %v1568_v51 = vsel %vm1418_vm15, 1.0, %v1903_v16 }
 0x318   :  { %1569 = vst [vmem:[%s2302_s4 + $0x30] sm:$0xff] %v1568_v51  ;;  %v1422_v52 = vsub.f32 1.0, %v1568_v51 }
 0x31a   :  { %v1423_v54 = vmul.f32 %v1422_v52, %v1417_v50 }
 0x31c   :  { %v1428_v56 = vmul.f32 0.9, %v1423_v54 }
 0x31e   :  { %v1429_v57 = vadd.f32 %v1428_v56, %v1427_v55 }
 0x320   :  { %vm1430_vm0 = vcmp.ge.f32.partialorder %v1429_v57, 1.0 }
 0x321   :  { %v1571_v37 = vsel %vm1430_vm0, 1.0, %v1903_v16 }
 0x322   :  { %1572 = vst [vmem:[%s2302_s4 + $0x38] sm:$0xff] %v1571_v37 }

</bundles_post_ra>
